<compile_context>
chip_gen: v5e
topology: v5e:2x2
jax: 0.10.0
libtpu: 0.0.40
codegen_flags: <defaults>
</compile_context>

<pallas_src>
import jax
import jax.numpy as jnp
from jax.experimental import pallas as pl
from jax.experimental.pallas import tpu as pltpu

# ---------------------------------------------------------------------------
# Architecture constants
# ---------------------------------------------------------------------------
IMG_H = IMG_W = 16
K = 3
C_IN, C1, C2 = 4, 8, 16
H1, W1 = IMG_H - K + 1, IMG_W - K + 1          # 14, 14
H2, W2 = H1 - K + 1, W1 - K + 1                # 12, 12
L1 = (H1 - 1) * IMG_W + W1                     # 222: full-width conv1 columns
L2 = (H2 - 1) * IMG_W + W2                     # 188: full-width conv2 columns
D_HID, D_OUT = 32, 10
FLAT = C2 * H2 * W2                            # 2304


# ---------------------------------------------------------------------------
# Fused Pallas kernel (one image per grid step)
# ---------------------------------------------------------------------------
def _cnn_fused_kernel(x_ref, w1_ref, b1_ref, w2_ref, b2_ref,
                      fc1w_ref, fc1b_ref, fc2w_ref, fc2b_ref, o_ref):
    """Whole CNN forward for one image, entirely in VMEM.

    x_ref:    (1, C_IN, IMG_H*IMG_W)  flat NCHW image (lane-dense, 256 lanes)
    w1_ref:   (K*K, C1, C_IN)         conv1 taps, tap index = kh*K + kw
    b1_ref:   (C1, 1)
    w2_ref:   (K*K, C2, C1)
    b2_ref:   (C2, 1)
    fc1w_ref: (C2, L2, D_HID)         fc1 weights in full-width conv2 layout
                                      (invalid columns zeroed host-side)
    fc1b_ref: (1, D_HID)
    fc2w_ref: (D_HID, D_OUT)
    fc2b_ref: (1, D_OUT)
    o_ref:    (1, 1, D_OUT)
    """
    x = x_ref[0]                                      # (C_IN, 256)

    # -- conv1 + bias + ReLU, full-width coords q = oh*IMG_W + ow -----------
    acc1 = jnp.zeros((C1, L1), jnp.float32)
    for kh in range(K):
        for kw in range(K):
            off = kh * IMG_W + kw
            acc1 = acc1 + jnp.dot(w1_ref[kh * K + kw], x[:, off:off + L1],
                                  preferred_element_type=jnp.float32)
    y1 = jnp.maximum(acc1 + b1_ref[...], 0.0)         # (C1, L1)

    # -- conv2 + bias + ReLU ------------------------------------------------
    acc2 = jnp.zeros((C2, L2), jnp.float32)
    for kh in range(K):
        for kw in range(K):
            off = kh * IMG_W + kw
            acc2 = acc2 + jnp.dot(w2_ref[kh * K + kw], y1[:, off:off + L2],
                                  preferred_element_type=jnp.float32)
    y2 = jnp.maximum(acc2 + b2_ref[...], 0.0)         # (C2, L2)

    # -- fc1 + ReLU: contract (channel, position); NCHW flatten order is
    #    baked into fc1w_ref, garbage columns hit zero weights. -------------
    acc3 = jnp.zeros((1, D_HID), jnp.float32)
    for c in range(C2):
        acc3 = acc3 + jnp.dot(y2[c:c + 1, :], fc1w_ref[c],
                              preferred_element_type=jnp.float32)
    h = jnp.maximum(acc3 + fc1b_ref[...], 0.0)        # (1, D_HID)

    # -- fc2 -----------------------------------------------------------------
    out = jnp.dot(h, fc2w_ref[...],
                  preferred_element_type=jnp.float32) + fc2b_ref[...]
    o_ref[0] = out.astype(o_ref.dtype)                # (1, D_OUT)


# ---------------------------------------------------------------------------
# Forward wrapper (single pallas_call)
# ---------------------------------------------------------------------------
def cnn_forward(x_nchw, kparams):
    # get_cnn_features: unsqueeze if 3-D (C, H, W) -> (1, C, H, W)
    if x_nchw.ndim == 3:
        x_nchw = x_nchw[None]
    n = x_nchw.shape[0]
    assert x_nchw.shape[1:] == (C_IN, IMG_H, IMG_W), x_nchw.shape

    # Metadata-only reshape (contiguous NCHW -> (N, C, H*W)); no transpose.
    x_flat = x_nchw.reshape(n, C_IN, IMG_H * IMG_W)

    w1, b1, w2, b2, fc1w, fc1b, fc2w, fc2b = kparams
    weights = (w1, b1, w2, b2, fc1w, fc1b, fc2w, fc2b)

    flops = 2 * n * (K * K * C1 * C_IN * L1
                     + K * K * C2 * C1 * L2
                     + C2 * L2 * D_HID
                     + D_HID * D_OUT)
    bytes_accessed = 4 * (x_flat.size + sum(a.size for a in weights)
                          + n * D_OUT)

    out = pl.pallas_call(
        _cnn_fused_kernel,
        out_shape=jax.ShapeDtypeStruct((n, 1, D_OUT), jnp.float32),
        grid=(n,),
        in_specs=[
            pl.BlockSpec((1, C_IN, IMG_H * IMG_W), lambda i: (i, 0, 0)),
            # Weights: constant index maps -> fetched into VMEM once.
            pl.BlockSpec(w1.shape, lambda i: (0, 0, 0)),
            pl.BlockSpec(b1.shape, lambda i: (0, 0)),
            pl.BlockSpec(w2.shape, lambda i: (0, 0, 0)),
            pl.BlockSpec(b2.shape, lambda i: (0, 0)),
            pl.BlockSpec(fc1w.shape, lambda i: (0, 0, 0)),
            pl.BlockSpec(fc1b.shape, lambda i: (0, 0)),
            pl.BlockSpec(fc2w.shape, lambda i: (0, 0)),
            pl.BlockSpec(fc2b.shape, lambda i: (0, 0)),
        ],
        out_specs=pl.BlockSpec((1, 1, D_OUT), lambda i: (i, 0, 0)),
        compiler_params=pltpu.CompilerParams(
            dimension_semantics=("parallel",)),
        cost_estimate=pl.CostEstimate(flops=flops, transcendentals=0,
                                      bytes_accessed=bytes_accessed),
    )(x_flat, *weights)
    return out.reshape(n, D_OUT)


# ---------------------------------------------------------------------------
# Parameters: torch-layout generation + packing into kernel layout
# ---------------------------------------------------------------------------
def init_torch_params(key):
    """Weights in PyTorch layouts: conv OIHW, linear (out_features, in)."""
    ks = jax.random.split(key, 8)
    s = 0.1
    c1w = s * jax.random.normal(ks[0], (C1, C_IN, K, K), jnp.float32)
    c1b = s * jax.random.normal(ks[1], (C1,), jnp.float32)
    c2w = s * jax.random.normal(ks[2], (C2, C1, K, K), jnp.float32)
    c2b = s * jax.random.normal(ks[3], (C2,), jnp.float32)
    f1w = s * jax.random.normal(ks[4], (D_HID, FLAT), jnp.float32)
    f1b = s * jax.random.normal(ks[5], (D_HID,), jnp.float32)
    f2w = s * jax.random.normal(ks[6], (D_OUT, D_HID), jnp.float32)
    f2b = s * jax.random.normal(ks[7], (D_OUT,), jnp.float32)
    return {"conv": [(c1w, c1b), (c2w, c2b)], "fc": [(f1w, f1b), (f2w, f2b)]}


def pack_kernel_params(tparams):
    """One-time host-side repack of torch-layout weights for the fused kernel."""
    (c1w, c1b), (c2w, c2b) = tparams["conv"]
    (f1w, f1b), (f2w, f2b) = tparams["fc"]

    # conv taps: (kh*K+kw, Cout, Cin)
    w1 = jnp.transpose(c1w, (2, 3, 0, 1)).reshape(K * K, C1, C_IN)
    w2 = jnp.transpose(c2w, (2, 3, 0, 1)).reshape(K * K, C2, C1)
    b1 = c1b.reshape(C1, 1)
    b2 = c2b.reshape(C2, 1)

    # fc1: torch weight (D_HID, FLAT) consumes NCHW-flatten index
    # c*H2*W2 + oh*W2 + ow.  Re-index rows to the kernel's full-width conv2
    # layout q = oh*IMG_W + ow, zero-padding the invalid ow columns.
    fw = f1w.T.reshape(C2, H2, W2, D_HID)                      # [c, oh, ow, j]
    fw = jnp.pad(fw, ((0, 0), (0, 0), (0, IMG_W - W2), (0, 0)))  # ow -> IMG_W
    fc1w = fw.reshape(C2, H2 * IMG_W, D_HID)[:, :L2, :]        # (C2, L2, D_HID)
    fc1b = f1b.reshape(1, D_HID)

    fc2w = f2w.T                                               # (D_HID, D_OUT)
    fc2b = f2b.reshape(1, D_OUT)
    return (w1, b1, w2, b2, fc1w, fc1b, fc2w, fc2b)


# ---------------------------------------------------------------------------
# Pure-JAX reference (mirrors the PyTorch module exactly)
# ---------------------------------------------------------------------------
def reference_forward(x_nchw, tparams):
    if x_nchw.ndim == 3:
        x_nchw = x_nchw[None]
    (c1w, c1b), (c2w, c2b) = tparams["conv"]
    (f1w, f1b), (f2w, f2b) = tparams["fc"]
    dn = ("NCHW", "OIHW", "NCHW")
    hp = jax.lax.Precision.HIGHEST

    y = jax.lax.conv_general_dilated(x_nchw, c1w, (1, 1), "VALID",
                                     dimension_numbers=dn, precision=hp)
    y = jnp.maximum(y + c1b[None, :, None, None], 0.0)
    y = jax.lax.conv_general_dilated(y, c2w, (1, 1), "VALID",
                                     dimension_numbers=dn, precision=hp)
    y = jnp.maximum(y + c2b[None, :, None, None], 0.0)
    flat = y.reshape(y.shape[0], -1)                   # torch x.view(N, -1)
    h = jnp.maximum(jnp.dot(flat, f1w.T, precision=hp) + f1b, 0.0)
    return jnp.dot(h, f2w.T, precision=hp) + f2b


if __name__ == "__main__":
    key = jax.random.PRNGKey(0)
    k_param, k_x = jax.random.split(key)
    tparams = init_torch_params(k_param)
    kparams = pack_kernel_params(tparams)

    # NCHW input, matching the PyTorch module's expected layout.
    x = jax.random.normal(k_x, (2, C_IN, IMG_H, IMG_W), jnp.float32)

    out = jax.block_until_ready(cnn_forward(x, kparams))
    assert out.shape == (2, D_OUT), out.shape

    ref = jax.block_until_ready(reference_forward(x, tparams))
    max_err = float(jnp.max(jnp.abs(out - ref)))
    assert max_err < 2e-2, f"mismatch vs reference, max abs err = {max_err}"

    print("KERNEL_OK")
</pallas_src>

<mosaic_0001>
module attributes {stable_mosaic.version = 11 : i64} {
  func.func @_cnn_fused_kernel(%arg0: i32, %arg1: memref<1x4x256xf32, #tpu.memory_space<vmem>>, %arg2: memref<9x8x4xf32, #tpu.memory_space<vmem>>, %arg3: memref<8x1xf32, #tpu.memory_space<vmem>>, %arg4: memref<9x16x8xf32, #tpu.memory_space<vmem>>, %arg5: memref<16x1xf32, #tpu.memory_space<vmem>>, %arg6: memref<16x188x32xf32, #tpu.memory_space<vmem>>, %arg7: memref<1x32xf32, #tpu.memory_space<vmem>>, %arg8: memref<32x10xf32, #tpu.memory_space<vmem>>, %arg9: memref<1x10xf32, #tpu.memory_space<vmem>>, %arg10: memref<1x1x10xf32, #tpu.memory_space<vmem>>) attributes {dimension_semantics = [#tpu.dimension_semantics<parallel>], iteration_bounds = array<i64: 2>, scalar_prefetch = 0 : i64, scratch_operands = 0 : i64, tpu.core_type = #tpu.core_type<tc>, window_params = [{transform_indices = @transform_0, window_bounds = array<i64: 1, 4, 256>}, {pipeline_mode = #tpu.pipeline_mode<synchronous>, transform_indices = @transform_1, window_bounds = array<i64: 9, 8, 4>}, {pipeline_mode = #tpu.pipeline_mode<synchronous>, transform_indices = @transform_2, window_bounds = array<i64: 8, 1>}, {pipeline_mode = #tpu.pipeline_mode<synchronous>, transform_indices = @transform_3, window_bounds = array<i64: 9, 16, 8>}, {pipeline_mode = #tpu.pipeline_mode<synchronous>, transform_indices = @transform_4, window_bounds = array<i64: 16, 1>}, {pipeline_mode = #tpu.pipeline_mode<synchronous>, transform_indices = @transform_5, window_bounds = array<i64: 16, 188, 32>}, {pipeline_mode = #tpu.pipeline_mode<synchronous>, transform_indices = @transform_6, window_bounds = array<i64: 1, 32>}, {pipeline_mode = #tpu.pipeline_mode<synchronous>, transform_indices = @transform_7, window_bounds = array<i64: 32, 10>}, {pipeline_mode = #tpu.pipeline_mode<synchronous>, transform_indices = @transform_8, window_bounds = array<i64: 1, 10>}, {transform_indices = @transform_9, window_bounds = array<i64: 1, 1, 10>}]} {
    %c0 = arith.constant 0 : index
    %c0_0 = arith.constant 0 : index
    %c0_1 = arith.constant 0 : index
    %0 = vector.load %arg1[%c0, %c0_0, %c0_1] : memref<1x4x256xf32, #tpu.memory_space<vmem>>, vector<1x4x256xf32>
    %1 = vector.shape_cast %0 : vector<1x4x256xf32> to vector<4x256xf32>
    %cst = arith.constant 0.000000e+00 : f32
    %2 = vector.broadcast %cst : f32 to vector<8x222xf32>
    %c0_2 = arith.constant 0 : index
    %c0_3 = arith.constant 0 : index
    %c0_4 = arith.constant 0 : index
    %3 = vector.load %arg2[%c0_2, %c0_3, %c0_4] : memref<9x8x4xf32, #tpu.memory_space<vmem>>, vector<1x8x4xf32>
    %4 = vector.shape_cast %3 : vector<1x8x4xf32> to vector<8x4xf32>
    %5 = vector.extract_strided_slice %1 {offsets = [0, 0], sizes = [4, 222], strides = [1, 1]} : vector<4x256xf32> to vector<4x222xf32>
    %cst_5 = arith.constant dense<0.000000e+00> : vector<8x222xf32>
    %6 = tpu.matmul %4, %5, %cst_5 {dimension_numbers = #tpu.dot_dimension_numbers<[1], [0], [0], [1], [0, 0, 1, 1], [], []>} : vector<8x4xf32>, vector<4x222xf32>, vector<8x222xf32> -> vector<8x222xf32>
    %7 = arith.addf %2, %6 : vector<8x222xf32>
    %c1 = arith.constant 1 : index
    %c0_6 = arith.constant 0 : index
    %c0_7 = arith.constant 0 : index
    %8 = vector.load %arg2[%c1, %c0_6, %c0_7] : memref<9x8x4xf32, #tpu.memory_space<vmem>>, vector<1x8x4xf32>
    %9 = vector.shape_cast %8 : vector<1x8x4xf32> to vector<8x4xf32>
    %10 = vector.extract_strided_slice %1 {offsets = [0, 1], sizes = [4, 222], strides = [1, 1]} : vector<4x256xf32> to vector<4x222xf32>
    %cst_8 = arith.constant dense<0.000000e+00> : vector<8x222xf32>
    %11 = tpu.matmul %9, %10, %cst_8 {dimension_numbers = #tpu.dot_dimension_numbers<[1], [0], [0], [1], [0, 0, 1, 1], [], []>} : vector<8x4xf32>, vector<4x222xf32>, vector<8x222xf32> -> vector<8x222xf32>
    %12 = arith.addf %7, %11 : vector<8x222xf32>
    %c2 = arith.constant 2 : index
    %c0_9 = arith.constant 0 : index
    %c0_10 = arith.constant 0 : index
    %13 = vector.load %arg2[%c2, %c0_9, %c0_10] : memref<9x8x4xf32, #tpu.memory_space<vmem>>, vector<1x8x4xf32>
    %14 = vector.shape_cast %13 : vector<1x8x4xf32> to vector<8x4xf32>
    %15 = vector.extract_strided_slice %1 {offsets = [0, 2], sizes = [4, 222], strides = [1, 1]} : vector<4x256xf32> to vector<4x222xf32>
    %cst_11 = arith.constant dense<0.000000e+00> : vector<8x222xf32>
    %16 = tpu.matmul %14, %15, %cst_11 {dimension_numbers = #tpu.dot_dimension_numbers<[1], [0], [0], [1], [0, 0, 1, 1], [], []>} : vector<8x4xf32>, vector<4x222xf32>, vector<8x222xf32> -> vector<8x222xf32>
    %17 = arith.addf %12, %16 : vector<8x222xf32>
    %c3 = arith.constant 3 : index
    %c0_12 = arith.constant 0 : index
    %c0_13 = arith.constant 0 : index
    %18 = vector.load %arg2[%c3, %c0_12, %c0_13] : memref<9x8x4xf32, #tpu.memory_space<vmem>>, vector<1x8x4xf32>
    %19 = vector.shape_cast %18 : vector<1x8x4xf32> to vector<8x4xf32>
    %20 = vector.extract_strided_slice %1 {offsets = [0, 16], sizes = [4, 222], strides = [1, 1]} : vector<4x256xf32> to vector<4x222xf32>
    %cst_14 = arith.constant dense<0.000000e+00> : vector<8x222xf32>
    %21 = tpu.matmul %19, %20, %cst_14 {dimension_numbers = #tpu.dot_dimension_numbers<[1], [0], [0], [1], [0, 0, 1, 1], [], []>} : vector<8x4xf32>, vector<4x222xf32>, vector<8x222xf32> -> vector<8x222xf32>
    %22 = arith.addf %17, %21 : vector<8x222xf32>
    %c4 = arith.constant 4 : index
    %c0_15 = arith.constant 0 : index
    %c0_16 = arith.constant 0 : index
    %23 = vector.load %arg2[%c4, %c0_15, %c0_16] : memref<9x8x4xf32, #tpu.memory_space<vmem>>, vector<1x8x4xf32>
    %24 = vector.shape_cast %23 : vector<1x8x4xf32> to vector<8x4xf32>
    %25 = vector.extract_strided_slice %1 {offsets = [0, 17], sizes = [4, 222], strides = [1, 1]} : vector<4x256xf32> to vector<4x222xf32>
    %cst_17 = arith.constant dense<0.000000e+00> : vector<8x222xf32>
    %26 = tpu.matmul %24, %25, %cst_17 {dimension_numbers = #tpu.dot_dimension_numbers<[1], [0], [0], [1], [0, 0, 1, 1], [], []>} : vector<8x4xf32>, vector<4x222xf32>, vector<8x222xf32> -> vector<8x222xf32>
    %27 = arith.addf %22, %26 : vector<8x222xf32>
    %c5 = arith.constant 5 : index
    %c0_18 = arith.constant 0 : index
    %c0_19 = arith.constant 0 : index
    %28 = vector.load %arg2[%c5, %c0_18, %c0_19] : memref<9x8x4xf32, #tpu.memory_space<vmem>>, vector<1x8x4xf32>
    %29 = vector.shape_cast %28 : vector<1x8x4xf32> to vector<8x4xf32>
    %30 = vector.extract_strided_slice %1 {offsets = [0, 18], sizes = [4, 222], strides = [1, 1]} : vector<4x256xf32> to vector<4x222xf32>
    %cst_20 = arith.constant dense<0.000000e+00> : vector<8x222xf32>
    %31 = tpu.matmul %29, %30, %cst_20 {dimension_numbers = #tpu.dot_dimension_numbers<[1], [0], [0], [1], [0, 0, 1, 1], [], []>} : vector<8x4xf32>, vector<4x222xf32>, vector<8x222xf32> -> vector<8x222xf32>
    %32 = arith.addf %27, %31 : vector<8x222xf32>
    %c6 = arith.constant 6 : index
    %c0_21 = arith.constant 0 : index
    %c0_22 = arith.constant 0 : index
    %33 = vector.load %arg2[%c6, %c0_21, %c0_22] : memref<9x8x4xf32, #tpu.memory_space<vmem>>, vector<1x8x4xf32>
    %34 = vector.shape_cast %33 : vector<1x8x4xf32> to vector<8x4xf32>
    %35 = vector.extract_strided_slice %1 {offsets = [0, 32], sizes = [4, 222], strides = [1, 1]} : vector<4x256xf32> to vector<4x222xf32>
    %cst_23 = arith.constant dense<0.000000e+00> : vector<8x222xf32>
    %36 = tpu.matmul %34, %35, %cst_23 {dimension_numbers = #tpu.dot_dimension_numbers<[1], [0], [0], [1], [0, 0, 1, 1], [], []>} : vector<8x4xf32>, vector<4x222xf32>, vector<8x222xf32> -> vector<8x222xf32>
    %37 = arith.addf %32, %36 : vector<8x222xf32>
    %c7 = arith.constant 7 : index
    %c0_24 = arith.constant 0 : index
    %c0_25 = arith.constant 0 : index
    %38 = vector.load %arg2[%c7, %c0_24, %c0_25] : memref<9x8x4xf32, #tpu.memory_space<vmem>>, vector<1x8x4xf32>
    %39 = vector.shape_cast %38 : vector<1x8x4xf32> to vector<8x4xf32>
    %40 = vector.extract_strided_slice %1 {offsets = [0, 33], sizes = [4, 222], strides = [1, 1]} : vector<4x256xf32> to vector<4x222xf32>
    %cst_26 = arith.constant dense<0.000000e+00> : vector<8x222xf32>
    %41 = tpu.matmul %39, %40, %cst_26 {dimension_numbers = #tpu.dot_dimension_numbers<[1], [0], [0], [1], [0, 0, 1, 1], [], []>} : vector<8x4xf32>, vector<4x222xf32>, vector<8x222xf32> -> vector<8x222xf32>
    %42 = arith.addf %37, %41 : vector<8x222xf32>
    %c8 = arith.constant 8 : index
    %c0_27 = arith.constant 0 : index
    %c0_28 = arith.constant 0 : index
    %43 = vector.load %arg2[%c8, %c0_27, %c0_28] : memref<9x8x4xf32, #tpu.memory_space<vmem>>, vector<1x8x4xf32>
    %44 = vector.shape_cast %43 : vector<1x8x4xf32> to vector<8x4xf32>
    %45 = vector.extract_strided_slice %1 {offsets = [0, 34], sizes = [4, 222], strides = [1, 1]} : vector<4x256xf32> to vector<4x222xf32>
    %cst_29 = arith.constant dense<0.000000e+00> : vector<8x222xf32>
    %46 = tpu.matmul %44, %45, %cst_29 {dimension_numbers = #tpu.dot_dimension_numbers<[1], [0], [0], [1], [0, 0, 1, 1], [], []>} : vector<8x4xf32>, vector<4x222xf32>, vector<8x222xf32> -> vector<8x222xf32>
    %47 = arith.addf %42, %46 : vector<8x222xf32>
    %c0_30 = arith.constant 0 : index
    %c0_31 = arith.constant 0 : index
    %48 = vector.load %arg3[%c0_30, %c0_31] : memref<8x1xf32, #tpu.memory_space<vmem>>, vector<8x1xf32>
    %49 = vector.broadcast %48 : vector<8x1xf32> to vector<8x222xf32>
    %50 = arith.addf %47, %49 : vector<8x222xf32>
    %cst_32 = arith.constant 0.000000e+00 : f32
    %51 = vector.broadcast %cst_32 : f32 to vector<8x222xf32>
    %52 = arith.maximumf %50, %51 : vector<8x222xf32>
    %cst_33 = arith.constant 0.000000e+00 : f32
    %53 = vector.broadcast %cst_33 : f32 to vector<16x188xf32>
    %c0_34 = arith.constant 0 : index
    %c0_35 = arith.constant 0 : index
    %c0_36 = arith.constant 0 : index
    %54 = vector.load %arg4[%c0_34, %c0_35, %c0_36] : memref<9x16x8xf32, #tpu.memory_space<vmem>>, vector<1x16x8xf32>
    %55 = vector.shape_cast %54 : vector<1x16x8xf32> to vector<16x8xf32>
    %56 = vector.extract_strided_slice %52 {offsets = [0, 0], sizes = [8, 188], strides = [1, 1]} : vector<8x222xf32> to vector<8x188xf32>
    %cst_37 = arith.constant dense<0.000000e+00> : vector<16x188xf32>
    %57 = tpu.matmul %55, %56, %cst_37 {dimension_numbers = #tpu.dot_dimension_numbers<[1], [0], [0], [1], [0, 0, 1, 1], [], []>} : vector<16x8xf32>, vector<8x188xf32>, vector<16x188xf32> -> vector<16x188xf32>
    %58 = arith.addf %53, %57 : vector<16x188xf32>
    %c1_38 = arith.constant 1 : index
    %c0_39 = arith.constant 0 : index
    %c0_40 = arith.constant 0 : index
    %59 = vector.load %arg4[%c1_38, %c0_39, %c0_40] : memref<9x16x8xf32, #tpu.memory_space<vmem>>, vector<1x16x8xf32>
    %60 = vector.shape_cast %59 : vector<1x16x8xf32> to vector<16x8xf32>
    %61 = vector.extract_strided_slice %52 {offsets = [0, 1], sizes = [8, 188], strides = [1, 1]} : vector<8x222xf32> to vector<8x188xf32>
    %cst_41 = arith.constant dense<0.000000e+00> : vector<16x188xf32>
    %62 = tpu.matmul %60, %61, %cst_41 {dimension_numbers = #tpu.dot_dimension_numbers<[1], [0], [0], [1], [0, 0, 1, 1], [], []>} : vector<16x8xf32>, vector<8x188xf32>, vector<16x188xf32> -> vector<16x188xf32>
    %63 = arith.addf %58, %62 : vector<16x188xf32>
    %c2_42 = arith.constant 2 : index
    %c0_43 = arith.constant 0 : index
    %c0_44 = arith.constant 0 : index
    %64 = vector.load %arg4[%c2_42, %c0_43, %c0_44] : memref<9x16x8xf32, #tpu.memory_space<vmem>>, vector<1x16x8xf32>
    %65 = vector.shape_cast %64 : vector<1x16x8xf32> to vector<16x8xf32>
    %66 = vector.extract_strided_slice %52 {offsets = [0, 2], sizes = [8, 188], strides = [1, 1]} : vector<8x222xf32> to vector<8x188xf32>
    %cst_45 = arith.constant dense<0.000000e+00> : vector<16x188xf32>
    %67 = tpu.matmul %65, %66, %cst_45 {dimension_numbers = #tpu.dot_dimension_numbers<[1], [0], [0], [1], [0, 0, 1, 1], [], []>} : vector<16x8xf32>, vector<8x188xf32>, vector<16x188xf32> -> vector<16x188xf32>
    %68 = arith.addf %63, %67 : vector<16x188xf32>
    %c3_46 = arith.constant 3 : index
    %c0_47 = arith.constant 0 : index
    %c0_48 = arith.constant 0 : index
    %69 = vector.load %arg4[%c3_46, %c0_47, %c0_48] : memref<9x16x8xf32, #tpu.memory_space<vmem>>, vector<1x16x8xf32>
    %70 = vector.shape_cast %69 : vector<1x16x8xf32> to vector<16x8xf32>
    %71 = vector.extract_strided_slice %52 {offsets = [0, 16], sizes = [8, 188], strides = [1, 1]} : vector<8x222xf32> to vector<8x188xf32>
    %cst_49 = arith.constant dense<0.000000e+00> : vector<16x188xf32>
    %72 = tpu.matmul %70, %71, %cst_49 {dimension_numbers = #tpu.dot_dimension_numbers<[1], [0], [0], [1], [0, 0, 1, 1], [], []>} : vector<16x8xf32>, vector<8x188xf32>, vector<16x188xf32> -> vector<16x188xf32>
    %73 = arith.addf %68, %72 : vector<16x188xf32>
    %c4_50 = arith.constant 4 : index
    %c0_51 = arith.constant 0 : index
    %c0_52 = arith.constant 0 : index
    %74 = vector.load %arg4[%c4_50, %c0_51, %c0_52] : memref<9x16x8xf32, #tpu.memory_space<vmem>>, vector<1x16x8xf32>
    %75 = vector.shape_cast %74 : vector<1x16x8xf32> to vector<16x8xf32>
    %76 = vector.extract_strided_slice %52 {offsets = [0, 17], sizes = [8, 188], strides = [1, 1]} : vector<8x222xf32> to vector<8x188xf32>
    %cst_53 = arith.constant dense<0.000000e+00> : vector<16x188xf32>
    %77 = tpu.matmul %75, %76, %cst_53 {dimension_numbers = #tpu.dot_dimension_numbers<[1], [0], [0], [1], [0, 0, 1, 1], [], []>} : vector<16x8xf32>, vector<8x188xf32>, vector<16x188xf32> -> vector<16x188xf32>
    %78 = arith.addf %73, %77 : vector<16x188xf32>
    %c5_54 = arith.constant 5 : index
    %c0_55 = arith.constant 0 : index
    %c0_56 = arith.constant 0 : index
    %79 = vector.load %arg4[%c5_54, %c0_55, %c0_56] : memref<9x16x8xf32, #tpu.memory_space<vmem>>, vector<1x16x8xf32>
    %80 = vector.shape_cast %79 : vector<1x16x8xf32> to vector<16x8xf32>
    %81 = vector.extract_strided_slice %52 {offsets = [0, 18], sizes = [8, 188], strides = [1, 1]} : vector<8x222xf32> to vector<8x188xf32>
    %cst_57 = arith.constant dense<0.000000e+00> : vector<16x188xf32>
    %82 = tpu.matmul %80, %81, %cst_57 {dimension_numbers = #tpu.dot_dimension_numbers<[1], [0], [0], [1], [0, 0, 1, 1], [], []>} : vector<16x8xf32>, vector<8x188xf32>, vector<16x188xf32> -> vector<16x188xf32>
    %83 = arith.addf %78, %82 : vector<16x188xf32>
    %c6_58 = arith.constant 6 : index
    %c0_59 = arith.constant 0 : index
    %c0_60 = arith.constant 0 : index
    %84 = vector.load %arg4[%c6_58, %c0_59, %c0_60] : memref<9x16x8xf32, #tpu.memory_space<vmem>>, vector<1x16x8xf32>
    %85 = vector.shape_cast %84 : vector<1x16x8xf32> to vector<16x8xf32>
    %86 = vector.extract_strided_slice %52 {offsets = [0, 32], sizes = [8, 188], strides = [1, 1]} : vector<8x222xf32> to vector<8x188xf32>
    %cst_61 = arith.constant dense<0.000000e+00> : vector<16x188xf32>
    %87 = tpu.matmul %85, %86, %cst_61 {dimension_numbers = #tpu.dot_dimension_numbers<[1], [0], [0], [1], [0, 0, 1, 1], [], []>} : vector<16x8xf32>, vector<8x188xf32>, vector<16x188xf32> -> vector<16x188xf32>
    %88 = arith.addf %83, %87 : vector<16x188xf32>
    %c7_62 = arith.constant 7 : index
    %c0_63 = arith.constant 0 : index
    %c0_64 = arith.constant 0 : index
    %89 = vector.load %arg4[%c7_62, %c0_63, %c0_64] : memref<9x16x8xf32, #tpu.memory_space<vmem>>, vector<1x16x8xf32>
    %90 = vector.shape_cast %89 : vector<1x16x8xf32> to vector<16x8xf32>
    %91 = vector.extract_strided_slice %52 {offsets = [0, 33], sizes = [8, 188], strides = [1, 1]} : vector<8x222xf32> to vector<8x188xf32>
    %cst_65 = arith.constant dense<0.000000e+00> : vector<16x188xf32>
    %92 = tpu.matmul %90, %91, %cst_65 {dimension_numbers = #tpu.dot_dimension_numbers<[1], [0], [0], [1], [0, 0, 1, 1], [], []>} : vector<16x8xf32>, vector<8x188xf32>, vector<16x188xf32> -> vector<16x188xf32>
    %93 = arith.addf %88, %92 : vector<16x188xf32>
    %c8_66 = arith.constant 8 : index
    %c0_67 = arith.constant 0 : index
    %c0_68 = arith.constant 0 : index
    %94 = vector.load %arg4[%c8_66, %c0_67, %c0_68] : memref<9x16x8xf32, #tpu.memory_space<vmem>>, vector<1x16x8xf32>
    %95 = vector.shape_cast %94 : vector<1x16x8xf32> to vector<16x8xf32>
    %96 = vector.extract_strided_slice %52 {offsets = [0, 34], sizes = [8, 188], strides = [1, 1]} : vector<8x222xf32> to vector<8x188xf32>
    %cst_69 = arith.constant dense<0.000000e+00> : vector<16x188xf32>
    %97 = tpu.matmul %95, %96, %cst_69 {dimension_numbers = #tpu.dot_dimension_numbers<[1], [0], [0], [1], [0, 0, 1, 1], [], []>} : vector<16x8xf32>, vector<8x188xf32>, vector<16x188xf32> -> vector<16x188xf32>
    %98 = arith.addf %93, %97 : vector<16x188xf32>
    %c0_70 = arith.constant 0 : index
    %c0_71 = arith.constant 0 : index
    %99 = vector.load %arg5[%c0_70, %c0_71] : memref<16x1xf32, #tpu.memory_space<vmem>>, vector<16x1xf32>
    %100 = vector.broadcast %99 : vector<16x1xf32> to vector<16x188xf32>
    %101 = arith.addf %98, %100 : vector<16x188xf32>
    %cst_72 = arith.constant 0.000000e+00 : f32
    %102 = vector.broadcast %cst_72 : f32 to vector<16x188xf32>
    %103 = arith.maximumf %101, %102 : vector<16x188xf32>
    %cst_73 = arith.constant 0.000000e+00 : f32
    %104 = vector.broadcast %cst_73 : f32 to vector<1x32xf32>
    %105 = vector.extract_strided_slice %103 {offsets = [0, 0], sizes = [1, 188], strides = [1, 1]} : vector<16x188xf32> to vector<1x188xf32>
    %c0_74 = arith.constant 0 : index
    %c0_75 = arith.constant 0 : index
    %c0_76 = arith.constant 0 : index
    %106 = vector.load %arg6[%c0_74, %c0_75, %c0_76] : memref<16x188x32xf32, #tpu.memory_space<vmem>>, vector<1x188x32xf32>
    %107 = vector.shape_cast %106 : vector<1x188x32xf32> to vector<188x32xf32>
    %cst_77 = arith.constant dense<0.000000e+00> : vector<1x32xf32>
    %108 = tpu.matmul %105, %107, %cst_77 {dimension_numbers = #tpu.dot_dimension_numbers<[1], [0], [0], [1], [0, 0, 1, 1], [], []>} : vector<1x188xf32>, vector<188x32xf32>, vector<1x32xf32> -> vector<1x32xf32>
    %109 = arith.addf %104, %108 : vector<1x32xf32>
    %110 = vector.extract_strided_slice %103 {offsets = [1, 0], sizes = [1, 188], strides = [1, 1]} : vector<16x188xf32> to vector<1x188xf32>
    %c1_78 = arith.constant 1 : index
    %c0_79 = arith.constant 0 : index
    %c0_80 = arith.constant 0 : index
    %111 = vector.load %arg6[%c1_78, %c0_79, %c0_80] : memref<16x188x32xf32, #tpu.memory_space<vmem>>, vector<1x188x32xf32>
    %112 = vector.shape_cast %111 : vector<1x188x32xf32> to vector<188x32xf32>
    %cst_81 = arith.constant dense<0.000000e+00> : vector<1x32xf32>
    %113 = tpu.matmul %110, %112, %cst_81 {dimension_numbers = #tpu.dot_dimension_numbers<[1], [0], [0], [1], [0, 0, 1, 1], [], []>} : vector<1x188xf32>, vector<188x32xf32>, vector<1x32xf32> -> vector<1x32xf32>
    %114 = arith.addf %109, %113 : vector<1x32xf32>
    %115 = vector.extract_strided_slice %103 {offsets = [2, 0], sizes = [1, 188], strides = [1, 1]} : vector<16x188xf32> to vector<1x188xf32>
    %c2_82 = arith.constant 2 : index
    %c0_83 = arith.constant 0 : index
    %c0_84 = arith.constant 0 : index
    %116 = vector.load %arg6[%c2_82, %c0_83, %c0_84] : memref<16x188x32xf32, #tpu.memory_space<vmem>>, vector<1x188x32xf32>
    %117 = vector.shape_cast %116 : vector<1x188x32xf32> to vector<188x32xf32>
    %cst_85 = arith.constant dense<0.000000e+00> : vector<1x32xf32>
    %118 = tpu.matmul %115, %117, %cst_85 {dimension_numbers = #tpu.dot_dimension_numbers<[1], [0], [0], [1], [0, 0, 1, 1], [], []>} : vector<1x188xf32>, vector<188x32xf32>, vector<1x32xf32> -> vector<1x32xf32>
    %119 = arith.addf %114, %118 : vector<1x32xf32>
    %120 = vector.extract_strided_slice %103 {offsets = [3, 0], sizes = [1, 188], strides = [1, 1]} : vector<16x188xf32> to vector<1x188xf32>
    %c3_86 = arith.constant 3 : index
    %c0_87 = arith.constant 0 : index
    %c0_88 = arith.constant 0 : index
    %121 = vector.load %arg6[%c3_86, %c0_87, %c0_88] : memref<16x188x32xf32, #tpu.memory_space<vmem>>, vector<1x188x32xf32>
    %122 = vector.shape_cast %121 : vector<1x188x32xf32> to vector<188x32xf32>
    %cst_89 = arith.constant dense<0.000000e+00> : vector<1x32xf32>
    %123 = tpu.matmul %120, %122, %cst_89 {dimension_numbers = #tpu.dot_dimension_numbers<[1], [0], [0], [1], [0, 0, 1, 1], [], []>} : vector<1x188xf32>, vector<188x32xf32>, vector<1x32xf32> -> vector<1x32xf32>
    %124 = arith.addf %119, %123 : vector<1x32xf32>
    %125 = vector.extract_strided_slice %103 {offsets = [4, 0], sizes = [1, 188], strides = [1, 1]} : vector<16x188xf32> to vector<1x188xf32>
    %c4_90 = arith.constant 4 : index
    %c0_91 = arith.constant 0 : index
    %c0_92 = arith.constant 0 : index
    %126 = vector.load %arg6[%c4_90, %c0_91, %c0_92] : memref<16x188x32xf32, #tpu.memory_space<vmem>>, vector<1x188x32xf32>
    %127 = vector.shape_cast %126 : vector<1x188x32xf32> to vector<188x32xf32>
    %cst_93 = arith.constant dense<0.000000e+00> : vector<1x32xf32>
    %128 = tpu.matmul %125, %127, %cst_93 {dimension_numbers = #tpu.dot_dimension_numbers<[1], [0], [0], [1], [0, 0, 1, 1], [], []>} : vector<1x188xf32>, vector<188x32xf32>, vector<1x32xf32> -> vector<1x32xf32>
    %129 = arith.addf %124, %128 : vector<1x32xf32>
    %130 = vector.extract_strided_slice %103 {offsets = [5, 0], sizes = [1, 188], strides = [1, 1]} : vector<16x188xf32> to vector<1x188xf32>
    %c5_94 = arith.constant 5 : index
    %c0_95 = arith.constant 0 : index
    %c0_96 = arith.constant 0 : index
    %131 = vector.load %arg6[%c5_94, %c0_95, %c0_96] : memref<16x188x32xf32, #tpu.memory_space<vmem>>, vector<1x188x32xf32>
    %132 = vector.shape_cast %131 : vector<1x188x32xf32> to vector<188x32xf32>
    %cst_97 = arith.constant dense<0.000000e+00> : vector<1x32xf32>
    %133 = tpu.matmul %130, %132, %cst_97 {dimension_numbers = #tpu.dot_dimension_numbers<[1], [0], [0], [1], [0, 0, 1, 1], [], []>} : vector<1x188xf32>, vector<188x32xf32>, vector<1x32xf32> -> vector<1x32xf32>
    %134 = arith.addf %129, %133 : vector<1x32xf32>
    %135 = vector.extract_strided_slice %103 {offsets = [6, 0], sizes = [1, 188], strides = [1, 1]} : vector<16x188xf32> to vector<1x188xf32>
    %c6_98 = arith.constant 6 : index
    %c0_99 = arith.constant 0 : index
    %c0_100 = arith.constant 0 : index
    %136 = vector.load %arg6[%c6_98, %c0_99, %c0_100] : memref<16x188x32xf32, #tpu.memory_space<vmem>>, vector<1x188x32xf32>
    %137 = vector.shape_cast %136 : vector<1x188x32xf32> to vector<188x32xf32>
    %cst_101 = arith.constant dense<0.000000e+00> : vector<1x32xf32>
    %138 = tpu.matmul %135, %137, %cst_101 {dimension_numbers = #tpu.dot_dimension_numbers<[1], [0], [0], [1], [0, 0, 1, 1], [], []>} : vector<1x188xf32>, vector<188x32xf32>, vector<1x32xf32> -> vector<1x32xf32>
    %139 = arith.addf %134, %138 : vector<1x32xf32>
    %140 = vector.extract_strided_slice %103 {offsets = [7, 0], sizes = [1, 188], strides = [1, 1]} : vector<16x188xf32> to vector<1x188xf32>
    %c7_102 = arith.constant 7 : index
    %c0_103 = arith.constant 0 : index
    %c0_104 = arith.constant 0 : index
    %141 = vector.load %arg6[%c7_102, %c0_103, %c0_104] : memref<16x188x32xf32, #tpu.memory_space<vmem>>, vector<1x188x32xf32>
    %142 = vector.shape_cast %141 : vector<1x188x32xf32> to vector<188x32xf32>
    %cst_105 = arith.constant dense<0.000000e+00> : vector<1x32xf32>
    %143 = tpu.matmul %140, %142, %cst_105 {dimension_numbers = #tpu.dot_dimension_numbers<[1], [0], [0], [1], [0, 0, 1, 1], [], []>} : vector<1x188xf32>, vector<188x32xf32>, vector<1x32xf32> -> vector<1x32xf32>
    %144 = arith.addf %139, %143 : vector<1x32xf32>
    %145 = vector.extract_strided_slice %103 {offsets = [8, 0], sizes = [1, 188], strides = [1, 1]} : vector<16x188xf32> to vector<1x188xf32>
    %c8_106 = arith.constant 8 : index
    %c0_107 = arith.constant 0 : index
    %c0_108 = arith.constant 0 : index
    %146 = vector.load %arg6[%c8_106, %c0_107, %c0_108] : memref<16x188x32xf32, #tpu.memory_space<vmem>>, vector<1x188x32xf32>
    %147 = vector.shape_cast %146 : vector<1x188x32xf32> to vector<188x32xf32>
    %cst_109 = arith.constant dense<0.000000e+00> : vector<1x32xf32>
    %148 = tpu.matmul %145, %147, %cst_109 {dimension_numbers = #tpu.dot_dimension_numbers<[1], [0], [0], [1], [0, 0, 1, 1], [], []>} : vector<1x188xf32>, vector<188x32xf32>, vector<1x32xf32> -> vector<1x32xf32>
    %149 = arith.addf %144, %148 : vector<1x32xf32>
    %150 = vector.extract_strided_slice %103 {offsets = [9, 0], sizes = [1, 188], strides = [1, 1]} : vector<16x188xf32> to vector<1x188xf32>
    %c9 = arith.constant 9 : index
    %c0_110 = arith.constant 0 : index
    %c0_111 = arith.constant 0 : index
    %151 = vector.load %arg6[%c9, %c0_110, %c0_111] : memref<16x188x32xf32, #tpu.memory_space<vmem>>, vector<1x188x32xf32>
    %152 = vector.shape_cast %151 : vector<1x188x32xf32> to vector<188x32xf32>
    %cst_112 = arith.constant dense<0.000000e+00> : vector<1x32xf32>
    %153 = tpu.matmul %150, %152, %cst_112 {dimension_numbers = #tpu.dot_dimension_numbers<[1], [0], [0], [1], [0, 0, 1, 1], [], []>} : vector<1x188xf32>, vector<188x32xf32>, vector<1x32xf32> -> vector<1x32xf32>
    %154 = arith.addf %149, %153 : vector<1x32xf32>
    %155 = vector.extract_strided_slice %103 {offsets = [10, 0], sizes = [1, 188], strides = [1, 1]} : vector<16x188xf32> to vector<1x188xf32>
    %c10 = arith.constant 10 : index
    %c0_113 = arith.constant 0 : index
    %c0_114 = arith.constant 0 : index
    %156 = vector.load %arg6[%c10, %c0_113, %c0_114] : memref<16x188x32xf32, #tpu.memory_space<vmem>>, vector<1x188x32xf32>
    %157 = vector.shape_cast %156 : vector<1x188x32xf32> to vector<188x32xf32>
    %cst_115 = arith.constant dense<0.000000e+00> : vector<1x32xf32>
    %158 = tpu.matmul %155, %157, %cst_115 {dimension_numbers = #tpu.dot_dimension_numbers<[1], [0], [0], [1], [0, 0, 1, 1], [], []>} : vector<1x188xf32>, vector<188x32xf32>, vector<1x32xf32> -> vector<1x32xf32>
    %159 = arith.addf %154, %158 : vector<1x32xf32>
    %160 = vector.extract_strided_slice %103 {offsets = [11, 0], sizes = [1, 188], strides = [1, 1]} : vector<16x188xf32> to vector<1x188xf32>
    %c11 = arith.constant 11 : index
    %c0_116 = arith.constant 0 : index
    %c0_117 = arith.constant 0 : index
    %161 = vector.load %arg6[%c11, %c0_116, %c0_117] : memref<16x188x32xf32, #tpu.memory_space<vmem>>, vector<1x188x32xf32>
    %162 = vector.shape_cast %161 : vector<1x188x32xf32> to vector<188x32xf32>
    %cst_118 = arith.constant dense<0.000000e+00> : vector<1x32xf32>
    %163 = tpu.matmul %160, %162, %cst_118 {dimension_numbers = #tpu.dot_dimension_numbers<[1], [0], [0], [1], [0, 0, 1, 1], [], []>} : vector<1x188xf32>, vector<188x32xf32>, vector<1x32xf32> -> vector<1x32xf32>
    %164 = arith.addf %159, %163 : vector<1x32xf32>
    %165 = vector.extract_strided_slice %103 {offsets = [12, 0], sizes = [1, 188], strides = [1, 1]} : vector<16x188xf32> to vector<1x188xf32>
    %c12 = arith.constant 12 : index
    %c0_119 = arith.constant 0 : index
    %c0_120 = arith.constant 0 : index
    %166 = vector.load %arg6[%c12, %c0_119, %c0_120] : memref<16x188x32xf32, #tpu.memory_space<vmem>>, vector<1x188x32xf32>
    %167 = vector.shape_cast %166 : vector<1x188x32xf32> to vector<188x32xf32>
    %cst_121 = arith.constant dense<0.000000e+00> : vector<1x32xf32>
    %168 = tpu.matmul %165, %167, %cst_121 {dimension_numbers = #tpu.dot_dimension_numbers<[1], [0], [0], [1], [0, 0, 1, 1], [], []>} : vector<1x188xf32>, vector<188x32xf32>, vector<1x32xf32> -> vector<1x32xf32>
    %169 = arith.addf %164, %168 : vector<1x32xf32>
    %170 = vector.extract_strided_slice %103 {offsets = [13, 0], sizes = [1, 188], strides = [1, 1]} : vector<16x188xf32> to vector<1x188xf32>
    %c13 = arith.constant 13 : index
    %c0_122 = arith.constant 0 : index
    %c0_123 = arith.constant 0 : index
    %171 = vector.load %arg6[%c13, %c0_122, %c0_123] : memref<16x188x32xf32, #tpu.memory_space<vmem>>, vector<1x188x32xf32>
    %172 = vector.shape_cast %171 : vector<1x188x32xf32> to vector<188x32xf32>
    %cst_124 = arith.constant dense<0.000000e+00> : vector<1x32xf32>
    %173 = tpu.matmul %170, %172, %cst_124 {dimension_numbers = #tpu.dot_dimension_numbers<[1], [0], [0], [1], [0, 0, 1, 1], [], []>} : vector<1x188xf32>, vector<188x32xf32>, vector<1x32xf32> -> vector<1x32xf32>
    %174 = arith.addf %169, %173 : vector<1x32xf32>
    %175 = vector.extract_strided_slice %103 {offsets = [14, 0], sizes = [1, 188], strides = [1, 1]} : vector<16x188xf32> to vector<1x188xf32>
    %c14 = arith.constant 14 : index
    %c0_125 = arith.constant 0 : index
    %c0_126 = arith.constant 0 : index
    %176 = vector.load %arg6[%c14, %c0_125, %c0_126] : memref<16x188x32xf32, #tpu.memory_space<vmem>>, vector<1x188x32xf32>
    %177 = vector.shape_cast %176 : vector<1x188x32xf32> to vector<188x32xf32>
    %cst_127 = arith.constant dense<0.000000e+00> : vector<1x32xf32>
    %178 = tpu.matmul %175, %177, %cst_127 {dimension_numbers = #tpu.dot_dimension_numbers<[1], [0], [0], [1], [0, 0, 1, 1], [], []>} : vector<1x188xf32>, vector<188x32xf32>, vector<1x32xf32> -> vector<1x32xf32>
    %179 = arith.addf %174, %178 : vector<1x32xf32>
    %180 = vector.extract_strided_slice %103 {offsets = [15, 0], sizes = [1, 188], strides = [1, 1]} : vector<16x188xf32> to vector<1x188xf32>
    %c15 = arith.constant 15 : index
    %c0_128 = arith.constant 0 : index
    %c0_129 = arith.constant 0 : index
    %181 = vector.load %arg6[%c15, %c0_128, %c0_129] : memref<16x188x32xf32, #tpu.memory_space<vmem>>, vector<1x188x32xf32>
    %182 = vector.shape_cast %181 : vector<1x188x32xf32> to vector<188x32xf32>
    %cst_130 = arith.constant dense<0.000000e+00> : vector<1x32xf32>
    %183 = tpu.matmul %180, %182, %cst_130 {dimension_numbers = #tpu.dot_dimension_numbers<[1], [0], [0], [1], [0, 0, 1, 1], [], []>} : vector<1x188xf32>, vector<188x32xf32>, vector<1x32xf32> -> vector<1x32xf32>
    %184 = arith.addf %179, %183 : vector<1x32xf32>
    %c0_131 = arith.constant 0 : index
    %c0_132 = arith.constant 0 : index
    %185 = vector.load %arg7[%c0_131, %c0_132] : memref<1x32xf32, #tpu.memory_space<vmem>>, vector<1x32xf32>
    %186 = arith.addf %184, %185 : vector<1x32xf32>
    %cst_133 = arith.constant 0.000000e+00 : f32
    %187 = vector.broadcast %cst_133 : f32 to vector<1x32xf32>
    %188 = arith.maximumf %186, %187 : vector<1x32xf32>
    %c0_134 = arith.constant 0 : index
    %c0_135 = arith.constant 0 : index
    %189 = vector.load %arg8[%c0_134, %c0_135] : memref<32x10xf32, #tpu.memory_space<vmem>>, vector<32x10xf32>
    %cst_136 = arith.constant dense<0.000000e+00> : vector<1x10xf32>
    %190 = tpu.matmul %188, %189, %cst_136 {dimension_numbers = #tpu.dot_dimension_numbers<[1], [0], [0], [1], [0, 0, 1, 1], [], []>} : vector<1x32xf32>, vector<32x10xf32>, vector<1x10xf32> -> vector<1x10xf32>
    %c0_137 = arith.constant 0 : index
    %c0_138 = arith.constant 0 : index
    %191 = vector.load %arg9[%c0_137, %c0_138] : memref<1x10xf32, #tpu.memory_space<vmem>>, vector<1x10xf32>
    %192 = arith.addf %190, %191 : vector<1x10xf32>
    %c0_139 = arith.constant 0 : index
    %c0_140 = arith.constant 0 : index
    %c0_141 = arith.constant 0 : index
    %193 = vector.load %arg10[%c0_139, %c0_140, %c0_141] : memref<1x1x10xf32, #tpu.memory_space<vmem>>, vector<1x1x10xf32>
    %194 = vector.shape_cast %193 : vector<1x1x10xf32> to vector<1x10xf32>
    %195 = vector.shape_cast %192 : vector<1x10xf32> to vector<1x1x10xf32>
    tpu.vector_store %arg10[%c0_139, %c0_140, %c0_141], %195 {strides = array<i32>} : memref<1x1x10xf32, #tpu.memory_space<vmem>>, vector<1x1x10xf32>,
    return
  }
  func.func @transform_0(%arg0: i32) -> (i32, i32, i32) {
    %c0_i32 = arith.constant 0 : i32
    %c0_i32_0 = arith.constant 0 : i32
    %c0_i32_1 = arith.constant 0 : i32
    return %arg0, %c0_i32, %c0_i32_0 : i32, i32, i32
  }
  func.func @transform_1(%arg0: i32) -> (i32, i32, i32) {
    %c0_i32 = arith.constant 0 : i32
    %c0_i32_0 = arith.constant 0 : i32
    %c0_i32_1 = arith.constant 0 : i32
    %c0_i32_2 = arith.constant 0 : i32
    return %c0_i32, %c0_i32_0, %c0_i32_1 : i32, i32, i32
  }
  func.func @transform_2(%arg0: i32) -> (i32, i32) {
    %c0_i32 = arith.constant 0 : i32
    %c0_i32_0 = arith.constant 0 : i32
    %c0_i32_1 = arith.constant 0 : i32
    return %c0_i32, %c0_i32_0 : i32, i32
  }
  func.func @transform_3(%arg0: i32) -> (i32, i32, i32) {
    %c0_i32 = arith.constant 0 : i32
    %c0_i32_0 = arith.constant 0 : i32
    %c0_i32_1 = arith.constant 0 : i32
    %c0_i32_2 = arith.constant 0 : i32
    return %c0_i32, %c0_i32_0, %c0_i32_1 : i32, i32, i32
  }
  func.func @transform_4(%arg0: i32) -> (i32, i32) {
    %c0_i32 = arith.constant 0 : i32
    %c0_i32_0 = arith.constant 0 : i32
    %c0_i32_1 = arith.constant 0 : i32
    return %c0_i32, %c0_i32_0 : i32, i32
  }
  func.func @transform_5(%arg0: i32) -> (i32, i32, i32) {
    %c0_i32 = arith.constant 0 : i32
    %c0_i32_0 = arith.constant 0 : i32
    %c0_i32_1 = arith.constant 0 : i32
    %c0_i32_2 = arith.constant 0 : i32
    return %c0_i32, %c0_i32_0, %c0_i32_1 : i32, i32, i32
  }
  func.func @transform_6(%arg0: i32) -> (i32, i32) {
    %c0_i32 = arith.constant 0 : i32
    %c0_i32_0 = arith.constant 0 : i32
    %c0_i32_1 = arith.constant 0 : i32
    return %c0_i32, %c0_i32_0 : i32, i32
  }
  func.func @transform_7(%arg0: i32) -> (i32, i32) {
    %c0_i32 = arith.constant 0 : i32
    %c0_i32_0 = arith.constant 0 : i32
    %c0_i32_1 = arith.constant 0 : i32
    return %c0_i32, %c0_i32_0 : i32, i32
  }
  func.func @transform_8(%arg0: i32) -> (i32, i32) {
    %c0_i32 = arith.constant 0 : i32
    %c0_i32_0 = arith.constant 0 : i32
    %c0_i32_1 = arith.constant 0 : i32
    return %c0_i32, %c0_i32_0 : i32, i32
  }
  func.func @transform_9(%arg0: i32) -> (i32, i32, i32) {
    %c0_i32 = arith.constant 0 : i32
    %c0_i32_0 = arith.constant 0 : i32
    %c0_i32_1 = arith.constant 0 : i32
    return %arg0, %c0_i32, %c0_i32_0 : i32, i32, i32
  }
}

</mosaic_0001>

<bundles_post_ra>
// kernel: tpu_custom_call.1
= control target key start
LH: loop header
LB: loop body
LE: loop exit
PB: predicated region body
PF: predicated region fallthrough
CT: control target
= control target key end

     0   :  { %14 = vsyncpa [#allocation3], 0  ;;  %s5049_s0 = inlined_call_operand.vmem [shape: f32[2,4,256], index: 0, kind: input, shape index: {}]   ;;  %s5050_s1 = inlined_call_operand.vmem [shape: f32[9,8,4], index: 1, kind: input, shape index: {}]   ;;  %s5051_s2 = inlined_call_operand.vmem [shape: f32[8,1], index: 2, kind: input, shape index: {}]   ;;  %s5052_s3 = inlined_call_operand.vmem [shape: f32[9,16,8], index: 3, kind: input, shape index: {}]   ;;  %s5053_s4 = inlined_call_operand.vmem [shape: f32[16,1], index: 4, kind: input, shape index: {}]   ;;  %s5054_s5 = inlined_call_operand.vmem [shape: f32[16,188,32], index: 5, kind: input, shape index: {}]   ;;  %s5055_s6 = inlined_call_operand.vmem [shape: f32[1,32], index: 6, kind: input, shape index: {}]   ;;  %s5056_s7 = inlined_call_operand.vmem [shape: f32[32,10], index: 7, kind: input, shape index: {}]   ;;  %s5057_s8 = inlined_call_operand.vmem [shape: f32[1,10], index: 8, kind: input, shape index: {}]   ;;  %s5058_s9 = inlined_call_operand.hbm [shape: f32[2,1,10], index: 9, kind: output, shape index: {}]  }
   0x1   :  { %16 = vsyncpa [#allocation3 + $0x1], 0  ;;  %s3468_s30 = smov 0   ;;  %s3470_s10 = smov 0  }
   0x2   :  { %s3472_s11 = smov 0   ;;  %s3474_s12 = smov 0  }
   0x3 LB: > { %s3489_s13 = sadd.s32 4294967295, %s3407_s12   ;;  %s2756_s14 = sadd.s32 4294967294, %s3407_s12   ;;  %s3407_s12 = sphi %s3474_s12, %s5068_s12   ;;  %s3403_s11 = sphi %s3472_s11, %s5067_s11   ;;  %s3399_s10 = sphi %s3470_s10, %s5066_s10   ;;  %s3395_s30 = sphi %s3468_s30, %s5065_s30  }
   0x4   : > { %s3493_s15 = sadd.s32 1, %s3407_s12   ;;  %s223_s16 = sadd.s32 1, %s3403_s11 }
   0x5   : > { %s220_s17 = ssub.s32 %s3407_s12, %s3493_s15  ;;  %p233_p0 = scmp.ne.s32.totalorder %s3403_s11, %s3399_s10 }
   0x6   : > { %p221_p1 = scmp.eq.s32.totalorder %s220_s17, 0  ;;  %p234_p2 = scmp.eq.s32.totalorder %s3489_s13, 1 }
   0x7   : > { %p239_p3 = scmp.ne.s32.totalorder %s3399_s10, %s3395_s30  ;;  %p240_p4 = scmp.eq.s32.totalorder %s2756_s14, 1 }
   0x8   : > { %s3504_s18 = scalar_select %p221_p1, %s3403_s11, %s223_s16  }
   0x9   : > { %p3506_p5 = por %p234_p2, %p233_p0  ;;  %p3510_p6 = por %p240_p4, %p239_p3 }
   0xa   : > { %p2759_p7 = scmp.ge.s32.totalorder %s3407_s12, 1  ;;  %p290_p8 = scmp.lt.s32.totalorder %s3407_s12, 3 }
   0xc   : > { %p291_p9 = pnand %p2759_p7, %p290_p8 }
   0xd   : > { %p325_p10 = scmp.lt.s32.totalorder (!%p291_p9), %s3489_s13, 1  ;;  %s3409_s26 = smov (!%p291_p9), 127  }
   0xe   : > { %294 = sbr.rel (%p291_p9) target bundleno = 1087 (0x43f), region = 56  ;;  %s3410_s27 = smov (!%p291_p9), 126  }
   0xf   : > { %s3411_s28 = smov (!%p291_p9), 112   ;;  %s3412_s29 = smov (!%p291_p9), 111  }
  0x10   : > { %s3413_s14 = smov (!%p291_p9), 110   ;;  %s3414_s16 = smov (!%p291_p9), 96  }
  0x11   : > { %s5060_s17 = smov (!%p291_p9), 95   ;;  %s5063_s24 = smov (!%p291_p9), 95  }
  0x13   : > { %s326_s21 = scalar_select %p325_p10, %s3489_s13, 1  ;;  %vm348_vm0 = vcmask 1043456   ;;  %vm344_vm1 = vcmask 31744   ;;  %v331_v19 = vld [vmem:[%s5050_s1] sm:$0xff]  ;;  %vm342_vm2 = vcmask 1039360   ;;  %vm512_vm3 = vcmask 916480  }
  0x14   : > { %v2762_v23 = vld [vmem:[%s5050_s1 + $0x8] sm:$0xff]  ;;  %v2776_v26 = vld [vmem:[%s5050_s1 + $0x18] sm:$0xff]  ;;  %vm452_vm4 = vcmask 1031168   ;;  %v2771_v31 = vld [vmem:[%s5050_s1 + $0x10] sm:$0xff]  ;;  %vm572_vm5 = vcmask 908288   ;;  %v3417_v39 = vmov 0  }
  0x15   : > { %s3253_s22 = sshll.u32 %s326_s21, 3  ;;  %s5059_s21 = smov 94   ;;  %v2781_v36 = vld [vmem:[%s5050_s1 + $0x20] sm:$0xff]  ;;  %3302 = vset.pattern.permute.xlu1 %v3417_v39  ;;  %3343 = vset.pattern.permute.xlu2 %v3417_v39  ;;  %vm632_vm6 = vcmask 900096   ;;  %v2786_v40 = vld [vmem:[%s5050_s1 + $0x28] sm:$0xff]  ;;  %v2791_v42 = vld [vmem:[%s5050_s1 + $0x30] sm:$0xff] }
  0x16   : > { %s329_s25 = scalar_lea.vmem %s5049_s0, %s3253_s22  ;;  %v863_v38 = vld [vmem:[%s5051_s2] sm:$0xff]  ;;  %3344 = vset.pattern.permute.xlu0 %v3417_v39  ;;  %vm692_vm7 = vcmask 785408   ;;  %vm752_vm8 = vcmask 777216   ;;  %v2796_v46 = vld [vmem:[%s5050_s1 + $0x38] sm:$0xff]  ;;  %vm812_vm9 = vcmask 769024   ;;  %vm887_vm10 = vcmask 64512  }
  0x17   : > { %v330_v0 = vld [vmem:[%s329_s25] sm:$0xff]  ;;  %s5064_s25 = smov 94   ;;  %vm1528_vm11 = vcmask 490496   ;;  %vm2662_vm12 = vcmask 261120   ;;  %vm2686_vm13 = vcmask 73728  }
  0x18   : > { %335 = vst [vmem:[#allocation1] ss:$2 sm:$0xff] %v330_v0  ;;  %v2801_v51 = vld [vmem:[%s5050_s1 + $0x40] sm:$0xff] }
  0x1f   : > { %v336_v1 = vld.sshfl [vmem:[#allocation1] sm:$0xff pattern:$0x75316420]  ;;  %v337_v2 = vld.sshfl [vmem:[#allocation1 + $0x8] sm:$0xff pattern:$0x75316420] }
  0x20   : > { %338 = vrot.lane.b32.xlu0 %v336_v1, %s3409_s26  ;;  %393 = vst [vmem:[#allocation1] ss:$2 sm:$0xff] %v330_v0 }
  0x27   : > { %v394_v3 = vld.sshfl [vmem:[#allocation1] sm:$0xff pattern:$0x75316420]  ;;  %v395_v4 = vld.sshfl [vmem:[#allocation1 + $0x8] sm:$0xff pattern:$0x75316420] }
  0x28   : > { %340 = vrot.lane.b32.xlu0 %v337_v2, %s3409_s26  ;;  %445 = vst [vmem:[#allocation1] ss:$2 sm:$0xff] %v330_v0  ;;  %2767 = vmatpush.msk.msra.mxu2 %vm348_vm0, %v394_v3 }
  0x29   : > { %2769 = vmatpush.msk.msra.mxu3 %vm348_vm0, %v395_v4  ;;  %2768 = vmatmul.msk.f32.vlgmr.msra.gmra.mxu2 %vm344_vm1, %v331_v19 }
  0x2a   : > { %2770 = vmatmul.msk.f32.vlgmr.msra.gmra.mxu3 %vm344_vm1, %v331_v19 }
  0x2f   : > { %v446_v5 = vld.sshfl [vmem:[#allocation1] sm:$0xff pattern:$0x75316420]  ;;  %v447_v6 = vld.sshfl [vmem:[#allocation1 + $0x8] sm:$0xff pattern:$0x75316420] }
  0x30   : > { %448 = vrot.lane.b32.xlu1 %v446_v5, %s3410_s27  ;;  %505 = vst [vmem:[#allocation1] ss:$2 sm:$0xff] %v330_v0 }
  0x37   : > { %v506_v7 = vld.sshfl [vmem:[#allocation1] sm:$0xff pattern:$0x75316420]  ;;  %v507_v8 = vld.sshfl [vmem:[#allocation1 + $0x8] sm:$0xff pattern:$0x75316420] }
  0x38   : > { %450 = vrot.lane.b32.xlu1 %v447_v6, %s3410_s27  ;;  %565 = vst [vmem:[#allocation1] ss:$2 sm:$0xff] %v330_v0  ;;  %508 = vrot.lane.b32.xlu2 %v506_v7, %s3411_s28 }
  0x3f   : > { %v567_v9 = vld.sshfl [vmem:[#allocation1 + $0x8] sm:$0xff pattern:$0x75316420]  ;;  %v566_v10 = vld.sshfl [vmem:[#allocation1] sm:$0xff pattern:$0x75316420] }
  0x40   : > { %570 = vrot.lane.b32.xlu1 %v567_v9, %s3412_s29  ;;  %568 = vrot.lane.b32.xlu0 %v566_v10, %s3412_s29  ;;  %625 = vst [vmem:[#allocation1] ss:$2 sm:$0xff] %v330_v0 }
  0x41   : > { %510 = vrot.lane.b32.xlu2 %v507_v8, %s3411_s28 }
  0x47   : > { %v627_v11 = vld.sshfl [vmem:[#allocation1 + $0x8] sm:$0xff pattern:$0x75316420]  ;;  %v626_v12 = vld.sshfl [vmem:[#allocation1] sm:$0xff pattern:$0x75316420] }
  0x48   : > { %630 = vrot.lane.b32.xlu0 %v627_v11, %s3413_s14  ;;  %685 = vst [vmem:[#allocation1] ss:$2 sm:$0xff] %v330_v0 }
  0x49   : > { %628 = vrot.lane.b32.xlu2 %v626_v12, %s3413_s14 }
  0x4f   : > { %v686_v13 = vld.sshfl [vmem:[#allocation1] sm:$0xff pattern:$0x75316420]  ;;  %v687_v14 = vld.sshfl [vmem:[#allocation1 + $0x8] sm:$0xff pattern:$0x75316420] }
  0x50   : > { %688 = vrot.lane.b32.xlu1 %v686_v13, %s3414_s16  ;;  %745 = vst [vmem:[#allocation1] ss:$2 sm:$0xff] %v330_v0 }
  0x51   : > { %690 = vrot.lane.b32.xlu2 %v687_v14, %s3414_s16 }
  0x57   : > { %v747_v15 = vld.sshfl [vmem:[#allocation1 + $0x8] sm:$0xff pattern:$0x75316420]  ;;  %v746_v16 = vld.sshfl [vmem:[#allocation1] sm:$0xff pattern:$0x75316420] }
  0x58   : > { %750 = vrot.lane.b32.xlu1 %v747_v15, %s5060_s17  ;;  %748 = vrot.lane.b32.xlu0 %v746_v16, %s5060_s17  ;;  %805 = vst [vmem:[#allocation1] ss:$2 sm:$0xff] %v330_v0 }
  0x5f   : > { %v807_v17 = vld.sshfl [vmem:[#allocation1 + $0x8] sm:$0xff pattern:$0x75316420]  ;;  %v806_v18 = vld.sshfl [vmem:[#allocation1] sm:$0xff pattern:$0x75316420] }
  0x60   : > { %810 = vrot.lane.b32.xlu0 %v807_v17, %s5059_s21  ;;  %808 = vrot.lane.b32.xlu2 %v806_v18, %s5059_s21 }
  0x61   : > { %866 = vperm.xlu1 %3302, %v863_v38  }
  0x92   : > { %v339_v20 = vpop.permute.xlu0 %338  ;;  %v509_v21 = vpop.permute.xlu2 %508 }
  0x9a   : > { %v341_v22 = vpop.permute.xlu0 %340 }
  0x9b   : > { %v343_v24 = vsel %vm342_vm2, %v339_v20, %v341_v22  ;;  %v511_v25 = vpop.permute.xlu2 %510 }
  0x9c   : > { %2763 = vmatpush.msk.msra.mxu1 %vm348_vm0, %v343_v24  ;;  %v513_v27 = vsel %vm512_vm3, %v509_v21, %v511_v25  ;;  %2779 = vmatpush.msk.msrb.mxu3 %vm348_vm0, %v511_v25 }
  0x9d   : > { %2764 = vmatmul.msk.f32.vlgmr.msra.gmra.mxu1 %vm344_vm1, %v2762_v23  ;;  %2777 = vmatpush.msk.msrb.mxu2 %vm348_vm0, %v513_v27 }
  0x9e   : > { %2765 = vmatpush.msk.msrb.mxu1 %vm348_vm0, %v341_v22  ;;  %2778 = vmatmul.msk.f32.vlgmr.msrb.gmra.mxu2 %vm344_vm1, %v2776_v26 }
  0x9f   : > { %2780 = vmatmul.msk.f32.vlgmr.msrb.gmra.mxu3 %vm344_vm1, %v2776_v26 }
  0xa2   : > { %v449_v28 = vpop.permute.xlu1 %448 }
  0xa3   : > { %v629_v29 = vpop.permute.xlu2 %628 }
  0xa5   : > { %2766 = vmatmul.msk.f32.vlgmr.msrb.gmra.mxu1 %vm344_vm1, %v2762_v23 }
  0xaa   : > { %v451_v30 = vpop.permute.xlu1 %450 }
  0xab   : > { %v453_v32 = vsel %vm452_vm4, %v449_v28, %v451_v30  ;;  %2774 = vmatpush.msk.msra.mxu1 %vm348_vm0, %v451_v30  ;;  %v691_v33 = vpop.permute.xlu2 %690  ;;  %v1454_v30 = vld [vmem:[%s5053_s4] sm:$0xff] }
  0xac   : > { %2772 = vmatpush.msk.msra.mxu0 %vm348_vm0, %v453_v32  ;;  %v420_v58 = vpop.f32.mrf.mxu2  ;;  %v874_v32 = vld [vmem:[%s5052_s3 + $0x8] sm:$0xff] }
  0xad   : > { %2773 = vmatmul.msk.f32.vlgmr.msra.gmra.mxu0 %vm344_vm1, %v2771_v31  ;;  %2775 = vmatmul.msk.f32.vlgmr.msra.gmra.mxu1 %vm344_vm1, %v2771_v31  ;;  %v440_v56 = vpop.f32.mrf.mxu3  ;;  %v873_v31 = vld [vmem:[%s5052_s3] sm:$0xff] }
  0xb2   : > { %v571_v34 = vpop.permute.xlu1 %570  ;;  %v569_v35 = vpop.permute.xlu0 %568 }
  0xb3   : > { %v573_v37 = vsel %vm572_vm5, %v569_v35, %v571_v34  ;;  %2784 = vmatpush.msk.msrb.mxu1 %vm348_vm0, %v571_v34 }
  0xb4   : > { %2782 = vmatpush.msk.msrb.mxu0 %vm348_vm0, %v573_v37 }
  0xb5   : > { %2794 = vmatpush.msk.msra.mxu1 %vm348_vm0, %v691_v33  ;;  %2783 = vmatmul.msk.f32.vlgmr.msrb.gmra.mxu0 %vm344_vm1, %v2781_v36 }
  0xb6   : > { %2785 = vmatmul.msk.f32.vlgmr.msrb.gmra.mxu1 %vm344_vm1, %v2781_v36  ;;  %v2806_v36 = vld [vmem:[%s5052_s3 + $0x10] sm:$0xff] }
  0xba   : > { %v631_v41 = vpop.permute.xlu0 %630  ;;  %v809_v50 = vpop.permute.xlu2 %808 }
  0xbb   : > { %v633_v43 = vsel %vm632_vm6, %v629_v29, %v631_v41  ;;  %2789 = vmatpush.msk.msra.mxu3 %vm348_vm0, %v631_v41  ;;  %v2807_v41 = vld [vmem:[%s5052_s3 + $0x18] sm:$0xff] }
  0xbc   : > { %2787 = vmatpush.msk.msra.mxu2 %vm348_vm0, %v633_v43  ;;  %2790 = vmatmul.msk.f32.vlgmr.msra.gmra.mxu3 %vm344_vm1, %v2786_v40 }
  0xbd   : > { %2788 = vmatmul.msk.f32.vlgmr.msra.gmra.mxu2 %vm344_vm1, %v2786_v40 }
  0xbe   : > { %2795 = vmatmul.msk.f32.vlgmr.msra.gmra.mxu1 %vm344_vm1, %v2791_v42 }
  0xc2   : > { %v689_v44 = vpop.permute.xlu1 %688 }
  0xc3   : > { %v693_v45 = vsel %vm692_vm7, %v689_v44, %v691_v33  ;;  %v2823_v44 = vld [vmem:[%s5052_s3 + $0x38] sm:$0xff] }
  0xc4   : > { %2792 = vmatpush.msk.msra.mxu0 %vm348_vm0, %v693_v45 }
  0xc5   : > { %2793 = vmatmul.msk.f32.vlgmr.msra.gmra.mxu0 %vm344_vm1, %v2791_v42  ;;  %v2822_v42 = vld [vmem:[%s5052_s3 + $0x30] sm:$0xff] }
  0xca   : > { %v751_v47 = vpop.permute.xlu1 %750  ;;  %v749_v48 = vpop.permute.xlu0 %748 }
  0xcb   : > { %v753_v49 = vsel %vm752_vm8, %v749_v48, %v751_v47  ;;  %2799 = vmatpush.msk.msrb.mxu3 %vm348_vm0, %v751_v47 }
  0xcc   : > { %2797 = vmatpush.msk.msrb.mxu2 %vm348_vm0, %v753_v49  ;;  %2800 = vmatmul.msk.f32.vlgmr.msrb.gmra.mxu3 %vm344_vm1, %v2796_v46 }
  0xcd   : > { %2798 = vmatmul.msk.f32.vlgmr.msrb.gmra.mxu2 %vm344_vm1, %v2796_v46 }
  0xd2   : > { %v811_v52 = vpop.permute.xlu0 %810 }
  0xd3   : > { %v813_v53 = vsel %vm812_vm9, %v809_v50, %v811_v52  ;;  %2804 = vmatpush.msk.msrb.mxu1 %vm348_vm0, %v811_v52  ;;  %v867_v21 = vpop.permute.xlu1 %866 }
  0xd4   : > { %2802 = vmatpush.msk.msrb.mxu0 %vm348_vm0, %v813_v53  ;;  %2805 = vmatmul.msk.f32.vlgmr.msrb.gmra.mxu1 %vm344_vm1, %v2801_v51 }
  0xd5   : > { %2803 = vmatmul.msk.f32.vlgmr.msrb.gmra.mxu0 %vm344_vm1, %v2801_v51  ;;  %v2816_v51 = vld [vmem:[%s5052_s3 + $0x20] sm:$0xff] }
 0x11a   : > { %v370_v54 = vpop.f32.mrf.mxu1 }
 0x11b   : > { %v421_v62 = vadd.f32 %v420_v58, %v370_v54 }
 0x121   : > { %v538_v0 = vpop.f32.mrf.mxu2 }
 0x122   : > { %v390_v55 = vpop.f32.mrf.mxu1  ;;  %v558_v61 = vpop.f32.mrf.mxu3 }
 0x123   : > { %v441_v60 = vadd.f32 %v440_v56, %v390_v55 }
 0x12a   : > { %v498_v57 = vpop.f32.mrf.mxu1  ;;  %v478_v59 = vpop.f32.mrf.mxu0 }
 0x12b   : > { %v502_v1 = vadd.f32 %v498_v57, %v441_v60  ;;  %v501_v3 = vadd.f32 %v478_v59, %v421_v62  ;;  %v2817_v60 = vld [vmem:[%s5052_s3 + $0x28] sm:$0xff] }
 0x12d   : > { %v562_v4 = vadd.f32 %v558_v61, %v502_v1  ;;  %v561_v5 = vadd.f32 %v538_v0, %v501_v3  ;;  %v2834_v61 = vld [vmem:[%s5052_s3 + $0x50] sm:$0xff] }
 0x132   : > { %v598_v2 = vpop.f32.mrf.mxu0 }
 0x133   : > { %v618_v63 = vpop.f32.mrf.mxu1  ;;  %v621_v9 = vadd.f32 %v598_v2, %v561_v5 }
 0x134   : > { %v622_v7 = vadd.f32 %v618_v63, %v562_v4  ;;  %v2828_v4 = vld [vmem:[%s5052_s3 + $0x40] sm:$0xff] }
 0x13b   : > { %v738_v10 = vpop.f32.mrf.mxu1 }
 0x13f   : > { %v678_v6 = vpop.f32.mrf.mxu3 }
 0x140   : > { %v658_v8 = vpop.f32.mrf.mxu2  ;;  %v682_v11 = vadd.f32 %v678_v6, %v622_v7  ;;  %v2835_v7 = vld [vmem:[%s5052_s3 + $0x58] sm:$0xff] }
 0x141   : > { %v681_v13 = vadd.f32 %v658_v8, %v621_v9 }
 0x142   : > { %v718_v12 = vpop.f32.mrf.mxu0  ;;  %v742_v14 = vadd.f32 %v738_v10, %v682_v11  ;;  %v2829_v10 = vld [vmem:[%s5052_s3 + $0x48] sm:$0xff]  ;;  %v2846_v11 = vld [vmem:[%s5052_s3 + $0x70] sm:$0xff] }
 0x143   : > { %v741_v15 = vadd.f32 %v718_v12, %v681_v13  ;;  %v1455_v12 = vld [vmem:[%s5053_s4 + $0x8] sm:$0xff]  ;;  %v2840_v13 = vld [vmem:[%s5052_s3 + $0x60] sm:$0xff] }
 0x14f   : > { %v798_v16 = vpop.f32.mrf.mxu3 }
 0x150   : > { %v802_v17 = vadd.f32 %v798_v16, %v742_v14  ;;  %v778_v18 = vpop.f32.mrf.mxu2  ;;  %v2847_v14 = vld [vmem:[%s5052_s3 + $0x78] sm:$0xff]  ;;  %v2852_v16 = vld [vmem:[%s5052_s3 + $0x80] sm:$0xff] }
 0x151   : > { %v801_v19 = vadd.f32 %v778_v18, %v741_v15  ;;  %v858_v20 = vpop.f32.mrf.mxu1  ;;  %v2841_v15 = vld [vmem:[%s5052_s3 + $0x68] sm:$0xff]  ;;  %v2873_v18 = vld [vmem:[%s5054_s5 + $0x138] sm:$0xff] }
 0x152   : > { %v862_v22 = vadd.f32 %v858_v20, %v802_v17  ;;  %v838_v23 = vpop.f32.mrf.mxu0  ;;  %v2853_v17 = vld [vmem:[%s5052_s3 + $0x88] sm:$0xff] }
 0x153   : > { %v861_v24 = vadd.f32 %v838_v23, %v801_v19  ;;  %v2872_v19 = vld [vmem:[%s5054_s5 + $0x130] sm:$0xff]  ;;  %v2871_v20 = vld [vmem:[%s5054_s5 + $0x128] sm:$0xff] }
 0x154   : > { %v870_v25 = vadd.f32 %v867_v21, %v862_v22  ;;  %v2869_v22 = vld [vmem:[%s5054_s5 + $0x118] sm:$0xff] }
 0x155   : > { %v869_v26 = vadd.f32 %v867_v21, %v861_v24  ;;  %v2870_v21 = vld [vmem:[%s5054_s5 + $0x120] sm:$0xff]  ;;  %v2868_v24 = vld [vmem:[%s5054_s5 + $0x110] sm:$0xff] }
 0x156   : > { %v872_v27 = vmax.f32 %v870_v25, 0.0 }
 0x157   : > { %v871_v28 = vmax.f32 %v869_v26, 0.0 }
 0x158   : > { %984 = vmatpush.msra.mxu1 %v872_v27 }
 0x159   : > { %961 = vmatpush.msra.mxu0 %v871_v28  ;;  %v3313_v29 = vpack.i.bf16 %v871_v28, %v872_v27  ;;  %2814 = vmatmul.msk.f32.vlgmr.msra.gmra.mxu1 %vm887_vm10, %v873_v31  ;;  %v2867_v27 = vld [vmem:[%s5054_s5 + $0x108] sm:$0xff] }
 0x15a   : > { %2812 = vmatmul.msk.f32.vlgmr.msra.gmra.mxu0 %vm887_vm10, %v873_v31  ;;  %v2881_v31 = vld [vmem:[%s5054_s5 + $0x178] sm:$0xf] }
 0x15b   : > { %3314 = vrot.lane.b32.xlu1 %v3313_v29, %s3412_s29  ;;  %3309 = vrot.lane.b32.xlu0 %v3313_v29, %s3410_s27  ;;  %s323_s29 = sand.u32 1, %s3399_s10  }
 0x15c   : > { %3304 = vrot.lane.b32.xlu2 %v3313_v29, %s3409_s26  ;;  %s324_s17 = scalar_lea.vmem [#allocation2], %s323_s29  ;;  %s2689_s23 = scalar_lea.sflag [#allocation3], %s323_s29 }
 0x15d   : > { %s2699_s21 = sshll.u32 %s324_s17, 4  ;;  %s3365_s26 = scalar_lea.hbm %s5058_s9, 2  ;;  %s2700_s21 = int_to_ptr.vmem [resolvable:$true] %s2699_s21 }
 0x161   : > { %2815 = vmatmul.msk.f32.gmra.mxu1 %vm887_vm10, %v874_v32 }
 0x162   : > { %2813 = vmatmul.msk.f32.gmra.mxu0 %vm887_vm10, %v874_v32  ;;  %v2865_v32 = vld [vmem:[%s5054_s5 + $0xf8] sm:$0xff] }
 0x163   : > { %3329 = vrot.lane.b32.xlu1 %v3313_v29, %s3413_s14  ;;  %3324 = vrot.lane.b32.xlu0 %v3313_v29, %s3414_s16 }
 0x164   : > { %3319 = vrot.lane.b32.xlu2 %v3313_v29, %s3411_s28  ;;  %s2697_s28 = scalar_lea.hbm %s5058_s9, %s3489_s13 }
 0x165   : > { %s2701_s22 = sshll.u32 %s2697_s28, 4  ;;  %s2702_s22 = int_to_ptr.hbm [resolvable:$true] %s2701_s22 }
 0x16b   : > { %1458 = vperm.xlu1 %3302, %v1454_v30   ;;  %3339 = vrot.lane.b32.xlu0 %v3313_v29, %s5063_s24  ;;  %v1489_v30 = vld [vmem:[%s5054_s5 + $0x78] sm:$0xff]  ;;  %s3359_s24 = sshra.s32 %s2702_s22, 4  ;;  %s3360_s24 = int_to_ptr.hbm [resolvable:$true] %s3359_s24 }
 0x16c   : > { %3334 = vrot.lane.b32.xlu2 %v3313_v29, %s5064_s25  ;;  %v2866_v29 = vld [vmem:[%s5054_s5 + $0x100] sm:$0xff]  ;;  %s3361_s25 = scalar_lea.hbm %s3360_s24, 1  ;;  %p3366_p0 = scmp.lt.s32.totalorder %s3360_s24, %s5058_s9 }
 0x16d   : > { %p3362_p11 = scmp.ne.s32.totalorder %s3360_s24, %s3361_s25  ;;  %p3367_p1 = scmp.lt.s32.totalorder %s3365_s26, %s3361_s25 }
 0x16f   : > { %p3363_p12 = pnand %p3362_p11, %p3506_p5  ;;  %p3368_p2 = por %p3367_p1, %p3366_p0 }
 0x171   : > { %p3364_p13 = pneg %p3363_p12 }
 0x173   : > { %p3369_p3 = pnand %p3368_p2, %p3364_p13 }
 0x174   : > { %1463 = vperm.xlu2 %3343, %v1455_v12  }
 0x1b6   : > { %v3305_v33 = vpop.permute.xlu2 %3304 }
 0x1b7   : > { %v3307_v34 = vunpack.i.h.bf16 %v3305_v33  ;;  %v3306_v35 = vunpack.i.l.bf16 %v3305_v33  ;;  %v1488_v33 = vld [vmem:[%s5054_s5 + $0x70] sm:$0xff] }
 0x1b9   : > { %932 = vmatpush.msra.mxu3 %v3306_v35  ;;  %v884_v37 = vsel %vm342_vm2, %v3307_v34, %v3306_v35  ;;  %v2880_v34 = vld [vmem:[%s5054_s5 + $0x170] sm:$0xff] }
 0x1ba   : > { %909 = vmatpush.msra.mxu2 %v884_v37  ;;  %2810 = vmatmul.msk.f32.vlgmr.msra.gmra.mxu3 %vm887_vm10, %v2806_v36  ;;  %v2864_v35 = vld [vmem:[%s5054_s5 + $0xf0] sm:$0xff]  ;;  %v2879_v37 = vld [vmem:[%s5054_s5 + $0x168] sm:$0xff] }
 0x1bb   : > { %2808 = vmatmul.msk.f32.vlgmr.msra.gmra.mxu2 %vm887_vm10, %v2806_v36  ;;  %v1487_v36 = vld [vmem:[%s5054_s5 + $0x68] sm:$0xff] }
 0x1be   : > { %v3320_v38 = vpop.permute.xlu2 %3319 }
 0x1bf   : > { %v3322_v39 = vunpack.i.h.bf16 %v3320_v38  ;;  %v3321_v40 = vunpack.i.l.bf16 %v3320_v38 }
 0x1c1   : > { %1112 = vmatpush.msrb.mxu1 %v3321_v40  ;;  %v1065_v43 = vsel %vm512_vm3, %v3322_v39, %v3321_v40 }
 0x1c2   : > { %1089 = vmatpush.msrb.mxu0 %v1065_v43  ;;  %2811 = vmatmul.msk.f32.gmra.mxu3 %vm887_vm10, %v2807_v41 }
 0x1c3   : > { %2809 = vmatmul.msk.f32.gmra.mxu2 %vm887_vm10, %v2807_v41  ;;  %2826 = vmatmul.msk.f32.vlgmr.msrb.gmra.mxu1 %vm887_vm10, %v2822_v42  ;;  %v2863_v41 = vld [vmem:[%s5054_s5 + $0xe8] sm:$0xff] }
 0x1c4   : > { %2824 = vmatmul.msk.f32.vlgmr.msrb.gmra.mxu0 %vm887_vm10, %v2822_v42  ;;  %v1486_v42 = vld [vmem:[%s5054_s5 + $0x60] sm:$0xff] }
 0x1c6   : > { %v3335_v0 = vpop.permute.xlu2 %3334 }
 0x1c7   : > { %v3337_v5 = vunpack.i.h.bf16 %v3335_v0  ;;  %v3336_v6 = vunpack.i.l.bf16 %v3335_v0 }
 0x1c9   : > { %v1395_v9 = vsel %vm812_vm9, %v3337_v5, %v3336_v6  ;;  %v1495_v5 = vld [vmem:[%s5054_s5 + $0xa8] sm:$0xff] }
 0x1cb   : > { %2827 = vmatmul.msk.f32.gmra.mxu1 %vm887_vm10, %v2823_v44 }
 0x1cc   : > { %2825 = vmatmul.msk.f32.gmra.mxu0 %vm887_vm10, %v2823_v44 }
 0x1cd   : > { %v3315_v45 = vpop.permute.xlu1 %3314  ;;  %v3310_v46 = vpop.permute.xlu0 %3309 }
 0x1ce   : > { %v3317_v47 = vunpack.i.h.bf16 %v3315_v45  ;;  %v3316_v48 = vunpack.i.l.bf16 %v3315_v45  ;;  %v3312_v49 = vunpack.i.h.bf16 %v3310_v46  ;;  %v3311_v50 = vunpack.i.l.bf16 %v3310_v46  ;;  %v2878_v45 = vld [vmem:[%s5054_s5 + $0x160] sm:$0xff] }
 0x1d0   : > { %1046 = vmatpush.msrb.mxu3 %v3311_v50  ;;  %v999_v52 = vsel %vm452_vm4, %v3312_v49, %v3311_v50  ;;  %v1131_v53 = vsel %vm572_vm5, %v3317_v47, %v3316_v48  ;;  %v2862_v47 = vld [vmem:[%s5054_s5 + $0xe0] sm:$0xff]  ;;  %v2877_v49 = vld [vmem:[%s5054_s5 + $0x158] sm:$0xff] }
 0x1d1   : > { %1023 = vmatpush.msrb.mxu2 %v999_v52  ;;  %2820 = vmatmul.msk.f32.vlgmr.msrb.gmra.mxu3 %vm887_vm10, %v2816_v51  ;;  %v2861_v50 = vld [vmem:[%s5054_s5 + $0xd8] sm:$0xff]  ;;  %v2876_v52 = vld [vmem:[%s5054_s5 + $0x150] sm:$0xff] }
 0x1d2   : > { %1178 = vmatpush.msra.mxu3 %v3316_v48  ;;  %2818 = vmatmul.msk.f32.vlgmr.msrb.gmra.mxu2 %vm887_vm10, %v2816_v51  ;;  %v1485_v48 = vld [vmem:[%s5054_s5 + $0x58] sm:$0xff]  ;;  %v1484_v51 = vld [vmem:[%s5054_s5 + $0x50] sm:$0xff] }
 0x1d3   : > { %1155 = vmatpush.msra.mxu2 %v1131_v53  ;;  %v2860_v53 = vld [vmem:[%s5054_s5 + $0xd0] sm:$0xff] }
 0x1d5   : > { %v3330_v54 = vpop.permute.xlu1 %3329  ;;  %v3325_v55 = vpop.permute.xlu0 %3324 }
 0x1d6   : > { %v3332_v56 = vunpack.i.h.bf16 %v3330_v54  ;;  %v3331_v57 = vunpack.i.l.bf16 %v3330_v54  ;;  %v3327_v58 = vunpack.i.h.bf16 %v3325_v55  ;;  %v3326_v59 = vunpack.i.l.bf16 %v3325_v55  ;;  %v3738_v23 = vpop.f32.mrf.mxu1  ;;  %v1483_v54 = vld [vmem:[%s5054_s5 + $0x48] sm:$0xff] }
 0x1d7   : > { %v3743_v25 = vpop.f32.mrf.mxu0  ;;  %v2875_v55 = vld [vmem:[%s5054_s5 + $0x148] sm:$0xff] }
 0x1d8   : > { %1244 = vmatpush.msra.mxu1 %v3331_v57  ;;  %1310 = vmatpush.msrb.mxu3 %v3326_v59  ;;  %v1197_v62 = vsel %vm632_vm6, %v3332_v56, %v3331_v57  ;;  %v1263_v63 = vsel %vm692_vm7, %v3327_v58, %v3326_v59  ;;  %v2859_v56 = vld [vmem:[%s5054_s5 + $0xc8] sm:$0xff]  ;;  %v1482_v57 = vld [vmem:[%s5054_s5 + $0x40] sm:$0xff] }
 0x1d9   : > { %2821 = vmatmul.msk.f32.gmra.mxu3 %vm887_vm10, %v2817_v60  ;;  %1221 = vmatpush.msra.mxu0 %v1197_v62  ;;  %v2874_v59 = vld [vmem:[%s5054_s5 + $0x140] sm:$0xff]  ;;  %v1481_v62 = vld [vmem:[%s5054_s5 + $0x38] sm:$0xff] }
 0x1da   : > { %1287 = vmatpush.msrb.mxu2 %v1263_v63  ;;  %2838 = vmatmul.msk.f32.vlgmr.msra.gmra.mxu1 %vm887_vm10, %v2834_v61  ;;  %v2901_v63 = vld [vmem:[%s5054_s5 + $0x1f8] sm:$0xff] }
 0x1db   : > { %2819 = vmatmul.msk.f32.gmra.mxu2 %vm887_vm10, %v2817_v60  ;;  %2836 = vmatmul.msk.f32.vlgmr.msra.gmra.mxu0 %vm887_vm10, %v2834_v61  ;;  %v1497_v60 = vld [vmem:[%s5054_s5 + $0xb8] sm:$0xf]  ;;  %v2858_v61 = vld [vmem:[%s5054_s5 + $0xc0] sm:$0xff] }
 0x1dd   : > { %v3340_v1 = vpop.permute.xlu0 %3339 }
 0x1de   : > { %v3342_v2 = vunpack.i.h.bf16 %v3340_v1  ;;  %v3341_v3 = vunpack.i.l.bf16 %v3340_v1  ;;  %v989_v38 = vpop.f32.mrf.mxu1  ;;  %v1496_v1 = vld [vmem:[%s5054_s5 + $0xb0] sm:$0xff] }
 0x1df   : > { %v966_v39 = vpop.f32.mrf.mxu0 }
 0x1e0   : > { %1376 = vmatpush.msrb.mxu1 %v3341_v3  ;;  %v1329_v8 = vsel %vm752_vm8, %v3342_v2, %v3341_v3  ;;  %v2927_v2 = vld [vmem:[%s5054_s5 + $0x2b8] sm:$0xff]  ;;  %v1480_v3 = vld [vmem:[%s5054_s5 + $0x30] sm:$0xff] }
 0x1e1   : > { %2832 = vmatmul.msk.f32.vlgmr.msra.gmra.mxu3 %vm887_vm10, %v2828_v4  ;;  %1353 = vmatpush.msrb.mxu0 %v1329_v8  ;;  %v2899_v8 = vld [vmem:[%s5054_s5 + $0x1e8] sm:$0xff] }
 0x1e2   : > { %1442 = vmatpush.msra.mxu3 %v3336_v6  ;;  %2839 = vmatmul.msk.f32.gmra.mxu1 %vm887_vm10, %v2835_v7  ;;  %v2926_v6 = vld [vmem:[%s5054_s5 + $0x2b0] sm:$0xff] }
 0x1e3   : > { %2830 = vmatmul.msk.f32.vlgmr.msra.gmra.mxu2 %vm887_vm10, %v2828_v4  ;;  %2837 = vmatmul.msk.f32.gmra.mxu0 %vm887_vm10, %v2835_v7  ;;  %v2900_v4 = vld [vmem:[%s5054_s5 + $0x1f0] sm:$0xff]  ;;  %v1479_v7 = vld [vmem:[%s5054_s5 + $0x28] sm:$0xff] }
 0x1e4   : > { %1419 = vmatpush.msra.mxu2 %v1395_v9  ;;  %1534 = vmatpush.msra.mxu0 %v2873_v18  ;;  %v1494_v9 = vld [vmem:[%s5054_s5 + $0xa0] sm:$0xff]  ;;  %v2897_v18 = vld [vmem:[%s5054_s5 + $0x1d8] sm:$0xff] }
 0x1e5   : > { %2882 = vmatpush.msk.msra.mxu1 %vm348_vm0, %v2881_v31  ;;  %v1475_v31 = vld [vmem:[%s5054_s5 + $0x8] sm:$0xff] }
 0x1e6   : > { %1535 = vmatpush.msra.mxu0 %v2872_v19 }
 0x1e7   : > { %1563 = vmatpush.msra.mxu1 %v2880_v34  ;;  %v2921_v34 = vld [vmem:[%s5054_s5 + $0x288] sm:$0xff] }
 0x1e8   : > { %1536 = vmatpush.msra.mxu0 %v2871_v20  ;;  %v1492_v20 = vld [vmem:[%s5054_s5 + $0x90] sm:$0xff] }
 0x1e9   : > { %2833 = vmatmul.msk.f32.gmra.mxu3 %vm887_vm10, %v2829_v10  ;;  %1564 = vmatpush.msra.mxu1 %v2879_v37  ;;  %v1474_v37 = vld [vmem:[%s5054_s5] sm:$0xff] }
 0x1ea   : > { %2850 = vmatmul.msk.f32.vlgmr.msrb.gmra.mxu1 %vm887_vm10, %v2846_v11  ;;  %1537 = vmatpush.msra.mxu0 %v2870_v21  ;;  %v2923_v21 = vld [vmem:[%s5054_s5 + $0x298] sm:$0xff] }
 0x1eb   : > { %2831 = vmatmul.msk.f32.gmra.mxu2 %vm887_vm10, %v2829_v10  ;;  %2848 = vmatmul.msk.f32.vlgmr.msrb.gmra.mxu0 %vm887_vm10, %v2846_v11  ;;  %v2925_v10 = vld [vmem:[%s5054_s5 + $0x2a8] sm:$0xff] }
 0x1ec   : > { %1538 = vmatpush.msra.mxu0 %v2869_v22  ;;  %1565 = vmatpush.msra.mxu1 %v2878_v45  ;;  %v1476_v22 = vld [vmem:[%s5054_s5 + $0x10] sm:$0xff]  ;;  %v2893_v45 = vld [vmem:[%s5054_s5 + $0x1b8] sm:$0xff] }
 0x1ee   : > { %1539 = vmatpush.msra.mxu0 %v2868_v24  ;;  %1566 = vmatpush.msra.mxu1 %v2877_v49  ;;  %v2896_v24 = vld [vmem:[%s5054_s5 + $0x1d0] sm:$0xff] }
 0x1f0   : > { %1540 = vmatpush.msra.mxu0 %v2867_v27  ;;  %1567 = vmatpush.msra.mxu1 %v2876_v52  ;;  %v1491_v27 = vld [vmem:[%s5054_s5 + $0x88] sm:$0xff]  ;;  %v2918_v52 = vld [vmem:[%s5054_s5 + $0x270] sm:$0xff] }
 0x1f1   : > { %2844 = vmatmul.msk.f32.vlgmr.msrb.gmra.mxu3 %vm887_vm10, %v2840_v13 }
 0x1f2   : > { %2851 = vmatmul.msk.f32.gmra.mxu1 %vm887_vm10, %v2847_v14  ;;  %1541 = vmatpush.msra.mxu0 %v2866_v29 }
 0x1f3   : > { %2842 = vmatmul.msk.f32.vlgmr.msrb.gmra.mxu2 %vm887_vm10, %v2840_v13  ;;  %2849 = vmatmul.msk.f32.gmra.mxu0 %vm887_vm10, %v2847_v14  ;;  %v1478_v13 = vld [vmem:[%s5054_s5 + $0x20] sm:$0xff] }
 0x1f4   : > { %1579 = vmatpush.msrb.mxu2 %v1489_v30  ;;  %1542 = vmatpush.msra.mxu0 %v2865_v32  ;;  %v2898_v14 = vld [vmem:[%s5054_s5 + $0x1e0] sm:$0xff]  ;;  %v2922_v30 = vld [vmem:[%s5054_s5 + $0x290] sm:$0xff]  ;;  %v2895_v32 = vld [vmem:[%s5054_s5 + $0x1c8] sm:$0xff] }
 0x1f5   : > { %1568 = vmatpush.msra.mxu1 %v2875_v55  ;;  %2884 = vmatpush.msk.msrb.mxu3 %vm348_vm0, %v1497_v60  ;;  %v2891_v55 = vld [vmem:[%s5054_s5 + $0x1a8] sm:$0xff] }
 0x1f6   : > { %1580 = vmatpush.msrb.mxu2 %v1488_v33  ;;  %1543 = vmatpush.msra.mxu0 %v2864_v35  ;;  %v1490_v33 = vld [vmem:[%s5054_s5 + $0x80] sm:$0xff] }
 0x1f7   : > { %1569 = vmatpush.msra.mxu1 %v2874_v59  ;;  %1608 = vmatpush.msrb.mxu3 %v1496_v1  ;;  %v2932_v59 = vld [vmem:[%s5054_s5 + $0x2e0] sm:$0xff] }
 0x1f8   : > { %1581 = vmatpush.msrb.mxu2 %v1487_v36  ;;  %1544 = vmatpush.msra.mxu0 %v2863_v41  ;;  %v2920_v41 = vld [vmem:[%s5054_s5 + $0x280] sm:$0xff] }
 0x1f9   : > { %2845 = vmatmul.msk.f32.gmra.mxu3 %vm887_vm10, %v2841_v15  ;;  %1652 = vmatpush.msrb.mxu1 %v2901_v63  ;;  %v2905_v63 = vld [vmem:[%s5054_s5 + $0x218] sm:$0xff] }
 0x1fa   : > { %1582 = vmatpush.msrb.mxu2 %v1486_v42  ;;  %1545 = vmatpush.msra.mxu0 %v2862_v47  ;;  %v2935_v42 = vld [vmem:[%s5054_s5 + $0x2f8] sm:$0xf]  ;;  %v2908_v47 = vld [vmem:[%s5054_s5 + $0x230] sm:$0xff] }
 0x1fb   : > { %2843 = vmatmul.msk.f32.gmra.mxu2 %vm887_vm10, %v2841_v15  ;;  %1653 = vmatpush.msrb.mxu1 %v2900_v4  ;;  %v1493_v15 = vld [vmem:[%s5054_s5 + $0x98] sm:$0xff] }
 0x1fc   : > { %1583 = vmatpush.msrb.mxu2 %v1485_v48  ;;  %1546 = vmatpush.msra.mxu0 %v2861_v50  ;;  %v2934_v48 = vld [vmem:[%s5054_s5 + $0x2f0] sm:$0xff]  ;;  %v2889_v4 = vld [vmem:[%s5054_s5 + $0x198] sm:$0xff] }
 0x1fd   : > { %1609 = vmatpush.msrb.mxu3 %v1495_v5  ;;  %1654 = vmatpush.msrb.mxu1 %v2899_v8  ;;  %v2892_v50 = vld [vmem:[%s5054_s5 + $0x1b0] sm:$0xff] }
 0x1fe   : > { %1584 = vmatpush.msrb.mxu2 %v1484_v51  ;;  %1547 = vmatpush.msra.mxu0 %v2860_v53  ;;  %v2907_v51 = vld [vmem:[%s5054_s5 + $0x228] sm:$0xff]  ;;  %v2904_v5 = vld [vmem:[%s5054_s5 + $0x210] sm:$0xff] }
 0x1ff   : > { %1610 = vmatpush.msrb.mxu3 %v1494_v9  ;;  %1655 = vmatpush.msrb.mxu1 %v2898_v14  ;;  %v2888_v8 = vld [vmem:[%s5054_s5 + $0x190] sm:$0xff]  ;;  %v2903_v9 = vld [vmem:[%s5054_s5 + $0x208] sm:$0xff] }
 0x200   : > { %1585 = vmatpush.msrb.mxu2 %v1483_v54  ;;  %1548 = vmatpush.msra.mxu0 %v2859_v56  ;;  %v2933_v54 = vld [vmem:[%s5054_s5 + $0x2e8] sm:$0xff]  ;;  %v2906_v56 = vld [vmem:[%s5054_s5 + $0x220] sm:$0xff] }
 0x201   : > { %2856 = vmatmul.msk.f32.vlgmr.msra.gmra.mxu3 %vm887_vm10, %v2852_v16  ;;  %1656 = vmatpush.msrb.mxu1 %v2897_v18  ;;  %v2887_v14 = vld [vmem:[%s5054_s5 + $0x188] sm:$0xff] }
 0x202   : > { %1586 = vmatpush.msrb.mxu2 %v1482_v57  ;;  %1549 = vmatpush.msra.mxu0 %v2858_v61  ;;  %v2917_v57 = vld [vmem:[%s5054_s5 + $0x268] sm:$0xff] }
 0x203   : > { %2854 = vmatmul.msk.f32.vlgmr.msra.gmra.mxu2 %vm887_vm10, %v2852_v16  ;;  %v2924_v16 = vld [vmem:[%s5054_s5 + $0x2a0] sm:$0xff]  ;;  %1611 = vmatpush.msrb.mxu3 %v1493_v15 }
 0x204   : > { %1587 = vmatpush.msrb.mxu2 %v1481_v62  ;;  %1726 = vmatpush.msrb.mxu0 %v2927_v2  ;;  %v2890_v62 = vld [vmem:[%s5054_s5 + $0x1a0] sm:$0xff] }
 0x205   : > { %1612 = vmatpush.msrb.mxu3 %v1492_v20  ;;  %1657 = vmatpush.msrb.mxu1 %v2896_v24  ;;  %v2916_v2 = vld [vmem:[%s5054_s5 + $0x260] sm:$0xff] }
 0x206   : > { %1588 = vmatpush.msrb.mxu2 %v1480_v3  ;;  %1727 = vmatpush.msrb.mxu0 %v2926_v6  ;;  %v2931_v3 = vld [vmem:[%s5054_s5 + $0x2d8] sm:$0xff]  ;;  %v2902_v15 = vld [vmem:[%s5054_s5 + $0x200] sm:$0xff] }
 0x207   : > { %1613 = vmatpush.msrb.mxu3 %v1491_v27  ;;  %1658 = vmatpush.msrb.mxu1 %v2895_v32  ;;  %v2915_v6 = vld [vmem:[%s5054_s5 + $0x258] sm:$0xff]  ;;  %v2912_v27 = vld [vmem:[%s5054_s5 + $0x240] sm:$0xff] }
 0x208   : > { %1589 = vmatpush.msrb.mxu2 %v1479_v7  ;;  %1728 = vmatpush.msrb.mxu0 %v2925_v10  ;;  %v2930_v7 = vld [vmem:[%s5054_s5 + $0x2d0] sm:$0xff] }
 0x209   : > { %2857 = vmatmul.msk.f32.gmra.mxu3 %vm887_vm10, %v2853_v17  ;;  %v2914_v10 = vld [vmem:[%s5054_s5 + $0x250] sm:$0xff] }
 0x20a   : > { %1590 = vmatpush.msrb.mxu2 %v1478_v13  ;;  %1729 = vmatpush.msrb.mxu0 %v2924_v16  ;;  %v2929_v13 = vld [vmem:[%s5054_s5 + $0x2c8] sm:$0xff] }
 0x20b   : > { %2855 = vmatmul.msk.f32.gmra.mxu2 %vm887_vm10, %v2853_v17  ;;  %v1477_v17 = vld [vmem:[%s5054_s5 + $0x18] sm:$0xff]  ;;  %1614 = vmatpush.msrb.mxu3 %v1490_v33  ;;  %v2913_v16 = vld [vmem:[%s5054_s5 + $0x248] sm:$0xff] }
 0x20c   : > { %1591 = vmatpush.msrb.mxu2 %v1477_v17  ;;  %1730 = vmatpush.msrb.mxu0 %v2923_v21  ;;  %v2886_v21 = vld [vmem:[%s5054_s5 + $0x180] sm:$0xff] }
 0x20e   : > { %1592 = vmatpush.msrb.mxu2 %v1476_v22  ;;  %1731 = vmatpush.msrb.mxu0 %v2922_v30 }
 0x210   : > { %1593 = vmatpush.msrb.mxu2 %v1475_v31  ;;  %1732 = vmatpush.msrb.mxu0 %v2921_v34 }
 0x212   : > { %1594 = vmatpush.msrb.mxu2 %v1474_v37  ;;  %1733 = vmatpush.msrb.mxu0 %v2920_v41 }
 0x214   : > { %2936 = vmatpush.msk.msra.mxu2 %vm348_vm0, %v2935_v42 }
 0x216   : > { %1755 = vmatpush.msra.mxu2 %v2934_v48  ;;  %v1459_v48 = vpop.permute.xlu1 %1458 }
 0x218   : > { %1756 = vmatpush.msra.mxu2 %v2933_v54  ;;  %v2953_v54 = vld [vmem:[%s5054_s5 + $0x378] sm:$0xff] }
 0x21a   : > { %1757 = vmatpush.msra.mxu2 %v2932_v59  ;;  %v2952_v59 = vld [vmem:[%s5054_s5 + $0x370] sm:$0xff] }
 0x21c   : > { %1758 = vmatpush.msra.mxu2 %v2931_v3  ;;  %v2977_v3 = vld [vmem:[%s5054_s5 + $0x428] sm:$0xff] }
 0x21e   : > { %1759 = vmatpush.msra.mxu2 %v2930_v7  ;;  %v2976_v7 = vld [vmem:[%s5054_s5 + $0x420] sm:$0xff] }
 0x220   : > { %1760 = vmatpush.msra.mxu2 %v2929_v13  ;;  %v2949_v13 = vld [vmem:[%s5054_s5 + $0x358] sm:$0xff] }
 0x23d   : > { %v3745_v26 = vpop.f32.mrf.mxu3 }
 0x23e   : > { %v3750_v28 = vpop.f32.mrf.mxu2  ;;  %v987_v31 = vadd.f32 %v3738_v23, %v3745_v26 }
 0x23f   : > { %v964_v33 = vadd.f32 %v3743_v25, %v3750_v28 }
 0x240   : > { %v3826_v58 = vpop.f32.mrf.mxu1 }
 0x241   : > { %v3844_v0 = vpop.f32.mrf.mxu0 }
 0x245   : > { %v937_v40 = vpop.f32.mrf.mxu3 }
 0x246   : > { %v3786_v43 = vadd.f32 %v989_v38, %v937_v40  ;;  %v914_v44 = vpop.f32.mrf.mxu2  ;;  %v2894_v38 = vld [vmem:[%s5054_s5 + $0x1c0] sm:$0xff] }
 0x247   : > { %v3791_v46 = vadd.f32 %v966_v39, %v914_v44  ;;  %v2909_v39 = vld [vmem:[%s5054_s5 + $0x238] sm:$0xf]  ;;  %1659 = vmatpush.msrb.mxu1 %v2894_v38 }
 0x248   : > { %v1117_v19 = vpop.f32.mrf.mxu1  ;;  %2910 = vmatpush.msk.msra.mxu3 %vm348_vm0, %v2909_v39 }
 0x249   : > { %v1094_v29 = vpop.f32.mrf.mxu0  ;;  %1660 = vmatpush.msrb.mxu1 %v2893_v45 }
 0x24a   : > { %1681 = vmatpush.msra.mxu3 %v2908_v47 }
 0x24b   : > { %1661 = vmatpush.msrb.mxu1 %v2892_v50 }
 0x24c   : > { %1682 = vmatpush.msra.mxu3 %v2907_v51 }
 0x24d   : > { %1662 = vmatpush.msrb.mxu1 %v2891_v55 }
 0x24e   : > { %1683 = vmatpush.msra.mxu3 %v2906_v56  ;;  %v2979_v56 = vld [vmem:[%s5054_s5 + $0x438] sm:$0xff] }
 0x24f   : > { %1663 = vmatpush.msrb.mxu1 %v2890_v62  ;;  %v2978_v62 = vld [vmem:[%s5054_s5 + $0x430] sm:$0xff] }
 0x250   : > { %1684 = vmatpush.msra.mxu3 %v2905_v63  ;;  %v2987_v63 = vld [vmem:[%s5054_s5 + $0x478] sm:$0xf] }
 0x251   : > { %1664 = vmatpush.msrb.mxu1 %v2889_v4  ;;  %v2986_v4 = vld [vmem:[%s5054_s5 + $0x470] sm:$0xff] }
 0x252   : > { %1685 = vmatpush.msra.mxu3 %v2904_v5  ;;  %v2950_v5 = vld [vmem:[%s5054_s5 + $0x360] sm:$0xff] }
 0x253   : > { %1665 = vmatpush.msrb.mxu1 %v2888_v8  ;;  %v2985_v8 = vld [vmem:[%s5054_s5 + $0x468] sm:$0xff] }
 0x254   : > { %v3876_v11 = vpop.f32.mrf.mxu3  ;;  %1686 = vmatpush.msra.mxu3 %v2903_v9  ;;  %v2958_v9 = vld [vmem:[%s5054_s5 + $0x3a0] sm:$0xff] }
 0x255   : > { %v3878_v12 = vpop.f32.mrf.mxu2  ;;  %1666 = vmatpush.msrb.mxu1 %v2887_v14  ;;  %v1055_v34 = vadd.f32 %v3876_v11, %v987_v31  ;;  %v2946_v31 = vld [vmem:[%s5054_s5 + $0x340] sm:$0xff] }
 0x256   : > { %1687 = vmatpush.msra.mxu3 %v2902_v15  ;;  %v2975_v15 = vld [vmem:[%s5054_s5 + $0x418] sm:$0xff] }
 0x257   : > { %v3972_v53 = vpop.f32.mrf.mxu1  ;;  %1667 = vmatpush.msrb.mxu1 %v2886_v21  ;;  %v1121_v38 = vadd.f32 %v3826_v58, %v1055_v34  ;;  %v2974_v21 = vld [vmem:[%s5054_s5 + $0x410] sm:$0xff]  ;;  %v2981_v34 = vld [vmem:[%s5054_s5 + $0x448] sm:$0xff] }
 0x258   : > { %v3989_v61 = vpop.f32.mrf.mxu0 }
 0x25c   : > { %v1051_v35 = vpop.f32.mrf.mxu3 }
 0x25d   : > { %v1057_v36 = vadd.f32 %v1051_v35, %v3786_v43 }
 0x25e   : > { %v1028_v40 = vpop.f32.mrf.mxu2 }
 0x25f   : > { %v1056_v43 = vadd.f32 %v1028_v40, %v3791_v46  ;;  %v3945_v44 = vadd.f32 %v1117_v19, %v1057_v36  ;;  %v2919_v46 = vld [vmem:[%s5054_s5 + $0x278] sm:$0xff]  ;;  %v1249_v18 = vpop.f32.mrf.mxu1  ;;  %v2928_v19 = vld [vmem:[%s5054_s5 + $0x2c0] sm:$0xff]  ;;  %v1054_v36 = vadd.f32 %v3878_v12, %v964_v33 }
 0x260   : > { %1734 = vmatpush.msrb.mxu0 %v2919_v46  ;;  %v1226_v24 = vpop.f32.mrf.mxu0  ;;  %1761 = vmatpush.msra.mxu2 %v2928_v19  ;;  %v2957_v19 = vld [vmem:[%s5054_s5 + $0x398] sm:$0xff]  ;;  %v2972_v33 = vld [vmem:[%s5054_s5 + $0x400] sm:$0xff] }
 0x261   : > { %v3961_v49 = vadd.f32 %v1094_v29, %v1056_v43  ;;  %v1120_v39 = vadd.f32 %v3844_v0, %v1054_v36  ;;  %v2954_v36 = vld [vmem:[%s5054_s5 + $0x380] sm:$0xff] }
 0x262   : > { %1735 = vmatpush.msrb.mxu0 %v2918_v52 }
 0x264   : > { %v1180_v60 = vpop.f32.mrf.mxu3  ;;  %1736 = vmatpush.msrb.mxu0 %v2917_v57 }
 0x265   : > { %v1187_v40 = vadd.f32 %v1180_v60, %v1121_v38  ;;  %v2961_v60 = vld [vmem:[%s5054_s5 + $0x3b8] sm:$0xf]  ;;  %v2980_v38 = vld [vmem:[%s5054_s5 + $0x440] sm:$0xff] }
 0x266   : > { %v1157_v1 = vpop.f32.mrf.mxu2  ;;  %1737 = vmatpush.msrb.mxu0 %v2916_v2  ;;  %v2960_v2 = vld [vmem:[%s5054_s5 + $0x3b0] sm:$0xff] }
 0x267   : > { %v1186_v41 = vadd.f32 %v1157_v1, %v1120_v39  ;;  %v1253_v43 = vadd.f32 %v3972_v53, %v1187_v40  ;;  %v2951_v1 = vld [vmem:[%s5054_s5 + $0x368] sm:$0xff]  ;;  %v3005_v39 = vld [vmem:[%s5054_s5 + $0x4f8] sm:$0xff]  ;;  %v2944_v40 = vld [vmem:[%s5054_s5 + $0x330] sm:$0xff] }
 0x268   : > { %1738 = vmatpush.msrb.mxu0 %v2915_v6  ;;  %v1355_v45 = vpop.f32.mrf.mxu0  ;;  %v2959_v6 = vld [vmem:[%s5054_s5 + $0x3a8] sm:$0xff] }
 0x269   : > { %v1252_v25 = vadd.f32 %v3989_v61, %v1186_v41  ;;  %v3031_v41 = vld [vmem:[%s5054_s5 + $0x5b8] sm:$0xff] }
 0x26a   : > { %1739 = vmatpush.msrb.mxu0 %v2914_v10 }
 0x26c   : > { %v1183_v17 = vpop.f32.mrf.mxu3  ;;  %1740 = vmatpush.msrb.mxu0 %v2913_v16  ;;  %v2984_v16 = vld [vmem:[%s5054_s5 + $0x460] sm:$0xff] }
 0x26d   : > { %v1189_v20 = vadd.f32 %v1183_v17, %v3945_v44  ;;  %v1378_v44 = vpop.f32.mrf.mxu1  ;;  %v2948_v17 = vld [vmem:[%s5054_s5 + $0x350] sm:$0xff] }
 0x26e   : > { %v1160_v22 = vpop.f32.mrf.mxu2  ;;  %1741 = vmatpush.msrb.mxu0 %v2912_v27  ;;  %v2956_v27 = vld [vmem:[%s5054_s5 + $0x390] sm:$0xff] }
 0x26f   : > { %v1188_v29 = vadd.f32 %v1160_v22, %v3961_v49  ;;  %v1255_v30 = vadd.f32 %v1249_v18, %v1189_v20  ;;  %v2983_v22 = vld [vmem:[%s5054_s5 + $0x458] sm:$0xff] }
 0x271   : > { %v1254_v32 = vadd.f32 %v1226_v24, %v1188_v29  ;;  %v2947_v24 = vld [vmem:[%s5054_s5 + $0x348] sm:$0xff] }
 0x272   : > { %v2973_v29 = vld [vmem:[%s5054_s5 + $0x408] sm:$0xff] }
 0x274   : > { %v1312_v35 = vpop.f32.mrf.mxu3 }
 0x275   : > { %v1319_v28 = vadd.f32 %v1312_v35, %v1253_v43  ;;  %v2945_v35 = vld [vmem:[%s5054_s5 + $0x338] sm:$0xff]  ;;  %v2970_v43 = vld [vmem:[%s5054_s5 + $0x3f0] sm:$0xff] }
 0x276   : > { %v1289_v37 = vpop.f32.mrf.mxu2 }
 0x277   : > { %v1318_v12 = vadd.f32 %v1289_v37, %v1252_v25  ;;  %v1385_v47 = vadd.f32 %v1378_v44, %v1319_v28  ;;  %v2971_v37 = vld [vmem:[%s5054_s5 + $0x3f8] sm:$0xff]  ;;  %v3004_v25 = vld [vmem:[%s5054_s5 + $0x4f0] sm:$0xff]  ;;  %v2943_v28 = vld [vmem:[%s5054_s5 + $0x328] sm:$0xff] }
 0x278   : > { %v3030_v44 = vld [vmem:[%s5054_s5 + $0x5b0] sm:$0xff] }
 0x279   : > { %v1384_v46 = vadd.f32 %v1355_v45, %v1318_v12  ;;  %v2969_v12 = vld [vmem:[%s5054_s5 + $0x3e8] sm:$0xff] }
 0x27a   : > { %v3003_v45 = vld [vmem:[%s5054_s5 + $0x4e8] sm:$0xff] }
 0x27c   : > { %v1315_v42 = vpop.f32.mrf.mxu3 }
 0x27d   : > { %v4056_v23 = vadd.f32 %v1315_v42, %v1255_v30  ;;  %v2982_v30 = vld [vmem:[%s5054_s5 + $0x450] sm:$0xff] }
 0x27e   : > { %v1292_v26 = vpop.f32.mrf.mxu2 }
 0x27f   : > { %v4059_v11 = vadd.f32 %v1292_v26, %v1254_v32  ;;  %v2955_v32 = vld [vmem:[%s5054_s5 + $0x388] sm:$0xff] }
 0x284   : > { %v1444_v58 = vpop.f32.mrf.mxu3 }
 0x285   : > { %v1451_v0 = vadd.f32 %v1444_v58, %v1385_v47  ;;  %v2942_v47 = vld [vmem:[%s5054_s5 + $0x320] sm:$0xff]  ;;  %v3029_v58 = vld [vmem:[%s5054_s5 + $0x5a8] sm:$0xff] }
 0x286   : > { %v1421_v49 = vpop.f32.mrf.mxu2 }
 0x287   : > { %v1467_v50 = vadd.f32 %v1459_v48, %v1451_v0  ;;  %v1450_v51 = vadd.f32 %v1421_v49, %v1384_v46  ;;  %v2968_v46 = vld [vmem:[%s5054_s5 + $0x3e0] sm:$0xff] }
 0x288   : > { %v3002_v0 = vld [vmem:[%s5054_s5 + $0x4e0] sm:$0xff] }
 0x289   : > { %v4061_v52 = vmax.f32 %v1467_v50, 0.0  ;;  %v1466_v53 = vadd.f32 %v1459_v48, %v1450_v51  ;;  %v2941_v48 = vld [vmem:[%s5054_s5 + $0x318] sm:$0xff]  ;;  %v3028_v49 = vld [vmem:[%s5054_s5 + $0x5a0] sm:$0xff] }
 0x28a   : > { %v2967_v50 = vld [vmem:[%s5054_s5 + $0x3d8] sm:$0xff] }
 0x28b   : > { %v4066_v55 = vmax.f32 %v1466_v53, 0.0  ;;  %2885 = vmatmul.msk.f32.vlgmr.msrb.gmra.mxu3 %vm1528_vm11, %v4061_v52  ;;  %v1526_v57 = vrot.slane %v4061_v52, 1  ;;  %v1645_v10 = vrot.slane %v4061_v52, 2  ;;  %v1719_v14 = vrot.slane %v4061_v52, 3  ;;  %v3001_v51 = vld [vmem:[%s5054_s5 + $0x4d8] sm:$0xff]  ;;  %v2940_v53 = vld [vmem:[%s5054_s5 + $0x310] sm:$0xff] }
 0x28c   : > { %1800 = vmatpush.msrb.mxu3 %v2953_v54  ;;  %v1793_v42 = vrot.slane %v4061_v52, 4  ;;  %v1867_v26 = vrot.slane %v4061_v52, 5  ;;  %v3027_v54 = vld [vmem:[%s5054_s5 + $0x598] sm:$0xff] }
 0x28d   : > { %1595 = vmatmul.f32.vlgmr.msrb.gmra.mxu2 %v4066_v55  ;;  %2883 = vmatmul.msk.f32.vlgmr.msra.gmra.mxu1 %vm1528_vm11, %v1526_v57  ;;  %v1525_v61 = vrot.slane %v4066_v55, 1  ;;  %v1644_v18 = vrot.slane %v4066_v55, 2  ;;  %v1718_v20 = vrot.slane %v4066_v55, 3  ;;  %v3000_v57 = vld [vmem:[%s5054_s5 + $0x4d0] sm:$0xff] }
 0x28e   : > { %1874 = vmatpush.msrb.mxu2 %v2979_v56  ;;  %1801 = vmatpush.msrb.mxu3 %v2952_v59  ;;  %v2966_v56 = vld [vmem:[%s5054_s5 + $0x3d0] sm:$0xff]  ;;  %v2939_v59 = vld [vmem:[%s5054_s5 + $0x308] sm:$0xff] }
 0x28f   : > { %2962 = vmatpush.msk.msra.mxu1 %vm348_vm0, %v2961_v60  ;;  %1550 = vmatmul.f32.vlgmr.msra.gmra.mxu0 %v1525_v61  ;;  %v3026_v60 = vld [vmem:[%s5054_s5 + $0x590] sm:$0xff]  ;;  %v2965_v61 = vld [vmem:[%s5054_s5 + $0x3c8] sm:$0xff] }
 0x290   : > { %1875 = vmatpush.msrb.mxu2 %v2978_v62  ;;  %2988 = vmatpush.msk.msra.mxu0 %vm348_vm0, %v2987_v63  ;;  %v2999_v62 = vld [vmem:[%s5054_s5 + $0x4c8] sm:$0xff]  ;;  %v2938_v63 = vld [vmem:[%s5054_s5 + $0x300] sm:$0xff] }
 0x291   : > { %1802 = vmatpush.msrb.mxu3 %v2951_v1  ;;  %1829 = vmatpush.msra.mxu1 %v2960_v2  ;;  %v3025_v1 = vld [vmem:[%s5054_s5 + $0x588] sm:$0xff]  ;;  %v1792_v2 = vrot.slane %v4066_v55, 4 }
 0x292   : > { %1876 = vmatpush.msrb.mxu2 %v2977_v3  ;;  %1903 = vmatpush.msra.mxu0 %v2986_v4  ;;  %v2964_v3 = vld [vmem:[%s5054_s5 + $0x3c0] sm:$0xff] }
 0x293   : > { %1803 = vmatpush.msrb.mxu3 %v2950_v5  ;;  %1830 = vmatpush.msra.mxu1 %v2959_v6  ;;  %v2998_v4 = vld [vmem:[%s5054_s5 + $0x4c0] sm:$0xff]  ;;  %v3013_v5 = vld [vmem:[%s5054_s5 + $0x538] sm:$0xf]  ;;  %v1866_v6 = vrot.slane %v4066_v55, 5 }
 0x294   : > { %1877 = vmatpush.msrb.mxu2 %v2976_v7  ;;  %1904 = vmatpush.msra.mxu0 %v2985_v8  ;;  %v3024_v7 = vld [vmem:[%s5054_s5 + $0x580] sm:$0xff]  ;;  %v3039_v8 = vld [vmem:[%s5054_s5 + $0x5f8] sm:$0xf] }
 0x295   : > { %2911 = vmatmul.msk.f32.vlgmr.msra.gmra.mxu3 %vm1528_vm11, %v1645_v10  ;;  %1831 = vmatpush.msra.mxu1 %v2958_v9  ;;  %v2997_v9 = vld [vmem:[%s5054_s5 + $0x4b8] sm:$0xff]  ;;  %v3012_v10 = vld [vmem:[%s5054_s5 + $0x530] sm:$0xff] }
 0x296   : > { %1804 = vmatpush.msrb.mxu3 %v2949_v13  ;;  %2937 = vmatmul.msk.f32.vlgmr.msra.gmra.mxu2 %vm1528_vm11, %v1719_v14  ;;  %v3023_v13 = vld [vmem:[%s5054_s5 + $0x578] sm:$0xff]  ;;  %v3038_v14 = vld [vmem:[%s5054_s5 + $0x5f0] sm:$0xff] }
 0x297   : > { %1878 = vmatpush.msrb.mxu2 %v2975_v15  ;;  %1905 = vmatpush.msra.mxu0 %v2984_v16  ;;  %v2996_v15 = vld [vmem:[%s5054_s5 + $0x4b0] sm:$0xff]  ;;  %v3011_v16 = vld [vmem:[%s5054_s5 + $0x528] sm:$0xff] }
 0x298   : > { %1668 = vmatmul.f32.vlgmr.msrb.gmra.mxu1 %v1644_v18  ;;  %1805 = vmatpush.msrb.mxu3 %v2948_v17  ;;  %v3022_v17 = vld [vmem:[%s5054_s5 + $0x570] sm:$0xff]  ;;  %v3037_v18 = vld [vmem:[%s5054_s5 + $0x5e8] sm:$0xff] }
 0x299   : > { %1832 = vmatpush.msra.mxu1 %v2957_v19  ;;  %1742 = vmatmul.f32.vlgmr.msrb.gmra.mxu0 %v1718_v20  ;;  %v2995_v19 = vld [vmem:[%s5054_s5 + $0x4a8] sm:$0xff]  ;;  %v3010_v20 = vld [vmem:[%s5054_s5 + $0x520] sm:$0xff] }
 0x29a   : > { %1879 = vmatpush.msrb.mxu2 %v2974_v21  ;;  %1906 = vmatpush.msra.mxu0 %v2983_v22  ;;  %v3021_v21 = vld [vmem:[%s5054_s5 + $0x568] sm:$0xff]  ;;  %v3036_v22 = vld [vmem:[%s5054_s5 + $0x5e0] sm:$0xff] }
 0x29b   : > { %1806 = vmatpush.msrb.mxu3 %v2947_v24  ;;  %1833 = vmatpush.msra.mxu1 %v2956_v27  ;;  %v2994_v24 = vld [vmem:[%s5054_s5 + $0x4a0] sm:$0xff]  ;;  %v3009_v27 = vld [vmem:[%s5054_s5 + $0x518] sm:$0xff] }
 0x29c   : > { %1880 = vmatpush.msrb.mxu2 %v2973_v29  ;;  %1907 = vmatpush.msra.mxu0 %v2982_v30  ;;  %v3020_v29 = vld [vmem:[%s5054_s5 + $0x560] sm:$0xff]  ;;  %v3035_v30 = vld [vmem:[%s5054_s5 + $0x5d8] sm:$0xff] }
 0x29d   : > { %1807 = vmatpush.msrb.mxu3 %v2946_v31  ;;  %1834 = vmatpush.msra.mxu1 %v2955_v32  ;;  %v2993_v31 = vld [vmem:[%s5054_s5 + $0x498] sm:$0xff]  ;;  %v3008_v32 = vld [vmem:[%s5054_s5 + $0x510] sm:$0xff] }
 0x29e   : > { %1881 = vmatpush.msrb.mxu2 %v2972_v33  ;;  %1908 = vmatpush.msra.mxu0 %v2981_v34  ;;  %v3019_v33 = vld [vmem:[%s5054_s5 + $0x558] sm:$0xff]  ;;  %v3034_v34 = vld [vmem:[%s5054_s5 + $0x5d0] sm:$0xff] }
 0x29f   : > { %1808 = vmatpush.msrb.mxu3 %v2945_v35  ;;  %1835 = vmatpush.msra.mxu1 %v2954_v36  ;;  %v2992_v35 = vld [vmem:[%s5054_s5 + $0x490] sm:$0xff]  ;;  %v3007_v36 = vld [vmem:[%s5054_s5 + $0x508] sm:$0xff] }
 0x2a0   : > { %1882 = vmatpush.msrb.mxu2 %v2971_v37  ;;  %1909 = vmatpush.msra.mxu0 %v2980_v38  ;;  %v3018_v37 = vld [vmem:[%s5054_s5 + $0x550] sm:$0xff]  ;;  %v3033_v38 = vld [vmem:[%s5054_s5 + $0x5c8] sm:$0xff] }
 0x2a1   : > { %1948 = vmatpush.msrb.mxu1 %v3005_v39  ;;  %1809 = vmatpush.msrb.mxu3 %v2944_v40  ;;  %v2991_v39 = vld [vmem:[%s5054_s5 + $0x488] sm:$0xff]  ;;  %v3006_v40 = vld [vmem:[%s5054_s5 + $0x500] sm:$0xff] }
 0x2a2   : > { %2963 = vmatmul.msk.f32.vlgmr.msra.gmra.mxu1 %vm1528_vm11, %v1793_v42  ;;  %2022 = vmatpush.msrb.mxu0 %v3031_v41  ;;  %v3017_v41 = vld [vmem:[%s5054_s5 + $0x548] sm:$0xff]  ;;  %v1941_v42 = vrot.slane %v4061_v52, 6 }
 0x2a3   : > { %1883 = vmatpush.msrb.mxu2 %v2970_v43  ;;  %2989 = vmatmul.msk.f32.vlgmr.msra.gmra.mxu0 %vm1528_vm11, %v1867_v26  ;;  %v3032_v43 = vld [vmem:[%s5054_s5 + $0x5c0] sm:$0xff]  ;;  %v3057_v26 = vld [vmem:[%s5054_s5 + $0x678] sm:$0xff] }
 0x2a4   : > { %1949 = vmatpush.msrb.mxu1 %v3004_v25  ;;  %1810 = vmatpush.msrb.mxu3 %v2943_v28  ;;  %v2990_v25 = vld [vmem:[%s5054_s5 + $0x480] sm:$0xff]  ;;  %v2015_v28 = vrot.slane %v4061_v52, 7  ;;  %v3065_v52 = vld [vmem:[%s5054_s5 + $0x6b8] sm:$0xf] }
 0x2a5   : > { %2023 = vmatpush.msrb.mxu0 %v3030_v44  ;;  %1884 = vmatpush.msrb.mxu2 %v2969_v12  ;;  %v3083_v44 = vld [vmem:[%s5054_s5 + $0x738] sm:$0xff]  ;;  %v1940_v12 = vrot.slane %v4066_v55, 6 }
 0x2a6   : > { %1950 = vmatpush.msrb.mxu1 %v3003_v45  ;;  %1811 = vmatpush.msrb.mxu3 %v2942_v47  ;;  %v3016_v45 = vld [vmem:[%s5054_s5 + $0x540] sm:$0xff]  ;;  %v3056_v47 = vld [vmem:[%s5054_s5 + $0x670] sm:$0xff] }
 0x2a7   : > { %2024 = vmatpush.msrb.mxu0 %v3029_v58  ;;  %1885 = vmatpush.msrb.mxu2 %v2968_v46  ;;  %v1381_v58 = vpop.f32.mrf.mxu1  ;;  %v2014_v46 = vrot.slane %v4066_v55, 7  ;;  %v3081_v55 = vld [vmem:[%s5054_s5 + $0x728] sm:$0xff] }
 0x2a8   : > { %1951 = vmatpush.msrb.mxu1 %v3002_v0  ;;  %1812 = vmatpush.msrb.mxu3 %v2941_v48  ;;  %v3082_v0 = vld [vmem:[%s5054_s5 + $0x730] sm:$0xff]  ;;  %v3091_v48 = vld [vmem:[%s5054_s5 + $0x778] sm:$0xf] }
 0x2a9   : > { %2025 = vmatpush.msrb.mxu0 %v3028_v49  ;;  %1886 = vmatpush.msrb.mxu2 %v2967_v50  ;;  %v3055_v49 = vld [vmem:[%s5054_s5 + $0x668] sm:$0xff]  ;;  %v3064_v50 = vld [vmem:[%s5054_s5 + $0x6b0] sm:$0xff] }
 0x2aa   : > { %1952 = vmatpush.msrb.mxu1 %v3001_v51  ;;  %1813 = vmatpush.msrb.mxu3 %v2940_v53  ;;  %v1447_v51 = vpop.f32.mrf.mxu3  ;;  %v3090_v53 = vld [vmem:[%s5054_s5 + $0x770] sm:$0xff] }
 0x2ab   : > { %2026 = vmatpush.msrb.mxu0 %v3027_v54  ;;  %1887 = vmatpush.msrb.mxu2 %v2966_v56  ;;  %v1387_v54 = vadd.f32 %v1381_v58, %v4056_v23  ;;  %v3054_v56 = vld [vmem:[%s5054_s5 + $0x660] sm:$0xff]  ;;  %v3089_v23 = vld [vmem:[%s5054_s5 + $0x768] sm:$0xff]  ;;  %v3104_v58 = vld [vmem:[%s5054_s5 + $0x7d0] sm:$0xff] }
 0x2ac   : > { %1953 = vmatpush.msrb.mxu1 %v3000_v57  ;;  %1814 = vmatpush.msrb.mxu3 %v2939_v59  ;;  %v3063_v57 = vld [vmem:[%s5054_s5 + $0x6a8] sm:$0xff]  ;;  %v3080_v59 = vld [vmem:[%s5054_s5 + $0x720] sm:$0xff] }
 0x2ad   : > { %2027 = vmatpush.msrb.mxu0 %v3026_v60  ;;  %1888 = vmatpush.msrb.mxu2 %v2965_v61  ;;  %v1453_v60 = vadd.f32 %v1447_v51, %v1387_v54  ;;  %v3053_v61 = vld [vmem:[%s5054_s5 + $0x658] sm:$0xff]  ;;  %v3042_v51 = vld [vmem:[%s5054_s5 + $0x600] sm:$0xff] }
 0x2ae   : > { %1954 = vmatpush.msrb.mxu1 %v2999_v62  ;;  %1815 = vmatpush.msrb.mxu3 %v2938_v63  ;;  %v3062_v62 = vld [vmem:[%s5054_s5 + $0x6a0] sm:$0xff]  ;;  %v4432_v63 = vpop.permute.xlu2 %1463 }
 0x2af   : > { %2028 = vmatpush.msrb.mxu0 %v3025_v1  ;;  %1816 = vmatmul.f32.vlgmr.msrb.gmra.mxu3 %v1792_v2  ;;  %v3079_v1 = vld [vmem:[%s5054_s5 + $0x718] sm:$0xff]  ;;  %v3088_v2 = vld [vmem:[%s5054_s5 + $0x760] sm:$0xff] }
 0x2b0   : > { %1889 = vmatpush.msrb.mxu2 %v2964_v3  ;;  %1955 = vmatpush.msrb.mxu1 %v2998_v4  ;;  %v3052_v3 = vld [vmem:[%s5054_s5 + $0x650] sm:$0xff]  ;;  %v3061_v4 = vld [vmem:[%s5054_s5 + $0x698] sm:$0xff]  ;;  %v3102_v54 = vld [vmem:[%s5054_s5 + $0x7c0] sm:$0xff] }
 0x2b1   : > { %3014 = vmatpush.msk.msra.mxu3 %vm348_vm0, %v3013_v5  ;;  %1890 = vmatmul.f32.vlgmr.msrb.gmra.mxu2 %v1866_v6  ;;  %v3078_v5 = vld [vmem:[%s5054_s5 + $0x710] sm:$0xff]  ;;  %v3087_v6 = vld [vmem:[%s5054_s5 + $0x758] sm:$0xff] }
 0x2b2   : > { %2029 = vmatpush.msrb.mxu0 %v3024_v7  ;;  %3040 = vmatpush.msk.msra.mxu2 %vm348_vm0, %v3039_v8  ;;  %v1469_v7 = vadd.f32 %v4432_v63, %v1453_v60  ;;  %v3051_v8 = vld [vmem:[%s5054_s5 + $0x648] sm:$0xff]  ;;  %v3101_v60 = vld [vmem:[%s5054_s5 + $0x7b8] sm:$0xff] }
 0x2b3   : > { %1956 = vmatpush.msrb.mxu1 %v2997_v9  ;;  %1977 = vmatpush.msra.mxu3 %v3012_v10  ;;  %v3060_v9 = vld [vmem:[%s5054_s5 + $0x690] sm:$0xff]  ;;  %v3077_v10 = vld [vmem:[%s5054_s5 + $0x708] sm:$0xff] }
 0x2b4   : > { %2030 = vmatpush.msrb.mxu0 %v3023_v13  ;;  %2051 = vmatpush.msra.mxu2 %v3038_v14  ;;  %v3086_v13 = vld [vmem:[%s5054_s5 + $0x750] sm:$0xff]  ;;  %v3050_v14 = vld [vmem:[%s5054_s5 + $0x640] sm:$0xff] }
 0x2b5   : > { %1957 = vmatpush.msrb.mxu1 %v2996_v15  ;;  %1978 = vmatpush.msra.mxu3 %v3011_v16  ;;  %v3059_v15 = vld [vmem:[%s5054_s5 + $0x688] sm:$0xff]  ;;  %v3076_v16 = vld [vmem:[%s5054_s5 + $0x700] sm:$0xff] }
 0x2b6   : > { %2031 = vmatpush.msrb.mxu0 %v3022_v17  ;;  %2052 = vmatpush.msra.mxu2 %v3037_v18  ;;  %v3085_v17 = vld [vmem:[%s5054_s5 + $0x748] sm:$0xff]  ;;  %v4477_v18 = vmax.f32 %v1469_v7, 0.0 }
 0x2b7   : > { %1958 = vmatpush.msrb.mxu1 %v2995_v19  ;;  %1979 = vmatpush.msra.mxu3 %v3010_v20  ;;  %v3049_v19 = vld [vmem:[%s5054_s5 + $0x638] sm:$0xff]  ;;  %v3058_v20 = vld [vmem:[%s5054_s5 + $0x680] sm:$0xff]  ;;  %v3125_v7 = vld [vmem:[%s5054_s5 + $0x868] sm:$0xff] }
 0x2b8   : > { %2032 = vmatpush.msrb.mxu0 %v3021_v21  ;;  %2053 = vmatpush.msra.mxu2 %v3036_v22  ;;  %v3075_v21 = vld [vmem:[%s5054_s5 + $0x6f8] sm:$0xff]  ;;  %v1358_v22 = vpop.f32.mrf.mxu0 }
 0x2b9   : > { %1959 = vmatpush.msrb.mxu1 %v2994_v24  ;;  %1980 = vmatpush.msra.mxu3 %v3009_v27  ;;  %v3084_v24 = vld [vmem:[%s5054_s5 + $0x740] sm:$0xff]  ;;  %v3109_v27 = vld [vmem:[%s5054_s5 + $0x7f8] sm:$0xff] }
 0x2ba   : > { %2033 = vmatpush.msrb.mxu0 %v3020_v29  ;;  %2054 = vmatpush.msra.mxu2 %v3035_v30  ;;  %v3048_v29 = vld [vmem:[%s5054_s5 + $0x630] sm:$0xff]  ;;  %v1424_v30 = vpop.f32.mrf.mxu2 }
 0x2bb   : > { %1960 = vmatpush.msrb.mxu1 %v2993_v31  ;;  %1981 = vmatpush.msra.mxu3 %v3008_v32  ;;  %v2162_v31 = vrot.slane %v4477_v18, 1  ;;  %v3135_v32 = vld [vmem:[%s5054_s5 + $0x8b8] sm:$0xff] }
 0x2bc   : > { %2034 = vmatpush.msrb.mxu0 %v3019_v33  ;;  %2055 = vmatpush.msra.mxu2 %v3034_v34  ;;  %v3074_v33 = vld [vmem:[%s5054_s5 + $0x6f0] sm:$0xff]  ;;  %v1386_v34 = vadd.f32 %v1358_v22, %v4059_v11  ;;  %v3073_v11 = vld [vmem:[%s5054_s5 + $0x6e8] sm:$0xff] }
 0x2bd   : > { %1961 = vmatpush.msrb.mxu1 %v2992_v35  ;;  %1982 = vmatpush.msra.mxu3 %v3007_v36  ;;  %v3108_v35 = vld [vmem:[%s5054_s5 + $0x7f0] sm:$0xff]  ;;  %v3047_v36 = vld [vmem:[%s5054_s5 + $0x628] sm:$0xff] }
 0x2be   : > { %2035 = vmatpush.msrb.mxu0 %v3018_v37  ;;  %2056 = vmatpush.msra.mxu2 %v3033_v38  ;;  %v3134_v37 = vld [vmem:[%s5054_s5 + $0x8b0] sm:$0xff]  ;;  %v1452_v38 = vadd.f32 %v1424_v30, %v1386_v34  ;;  %v3121_v30 = vld [vmem:[%s5054_s5 + $0x848] sm:$0xff]  ;;  %v3094_v34 = vld [vmem:[%s5054_s5 + $0x780] sm:$0xff] }
 0x2bf   : > { %1962 = vmatpush.msrb.mxu1 %v2991_v39  ;;  %1983 = vmatpush.msra.mxu3 %v3006_v40  ;;  %v3107_v39 = vld [vmem:[%s5054_s5 + $0x7e8] sm:$0xff]  ;;  %v3046_v40 = vld [vmem:[%s5054_s5 + $0x620] sm:$0xff]  ;;  %v3122_v22 = vld [vmem:[%s5054_s5 + $0x850] sm:$0xff] }
 0x2c0   : > { %3015 = vmatmul.msk.f32.vlgmr.msra.gmra.mxu3 %vm1528_vm11, %v1941_v42  ;;  %2036 = vmatpush.msrb.mxu0 %v3017_v41  ;;  %v3133_v41 = vld [vmem:[%s5054_s5 + $0x8a8] sm:$0xff]  ;;  %v3072_v42 = vld [vmem:[%s5054_s5 + $0x6e0] sm:$0xff] }
 0x2c1   : > { %2057 = vmatpush.msra.mxu2 %v3032_v43  ;;  %2094 = vmatpush.msrb.mxu3 %v3057_v26  ;;  %v3106_v43 = vld [vmem:[%s5054_s5 + $0x7e0] sm:$0xff]  ;;  %v3045_v26 = vld [vmem:[%s5054_s5 + $0x618] sm:$0xff] }
 0x2c2   : > { %1963 = vmatpush.msrb.mxu1 %v2990_v25  ;;  %3041 = vmatmul.msk.f32.vlgmr.msra.gmra.mxu2 %vm1528_vm11, %v2015_v28  ;;  %v3132_v25 = vld [vmem:[%s5054_s5 + $0x8a0] sm:$0xff]  ;;  %v3071_v28 = vld [vmem:[%s5054_s5 + $0x6d8] sm:$0xff] }
 0x2c3   : > { %2169 = vmatpush.msrb.mxu2 %v3083_v44  ;;  %1964 = vmatmul.f32.vlgmr.msrb.gmra.mxu1 %v1940_v12  ;;  %v1468_v44 = vadd.f32 %v4432_v63, %v1452_v38  ;;  %v3105_v12 = vld [vmem:[%s5054_s5 + $0x7d8] sm:$0xff]  ;;  %v3142_v63 = vld [vmem:[%s5054_s5 + $0x8f0] sm:$0xff] }
 0x2c4   : > { %2037 = vmatpush.msrb.mxu0 %v3016_v45  ;;  %2095 = vmatpush.msrb.mxu3 %v3056_v47  ;;  %v3044_v45 = vld [vmem:[%s5054_s5 + $0x610] sm:$0xff]  ;;  %v3131_v47 = vld [vmem:[%s5054_s5 + $0x898] sm:$0xff] }
 0x2c5   : > { %3066 = vmatpush.msk.msra.mxu1 %vm348_vm0, %v3065_v52  ;;  %2038 = vmatmul.f32.vlgmr.msrb.gmra.mxu0 %v2014_v46  ;;  %v3070_v52 = vld [vmem:[%s5054_s5 + $0x6d0] sm:$0xff]  ;;  %v3043_v46 = vld [vmem:[%s5054_s5 + $0x608] sm:$0xff] }
 0x2c6   : > { %2170 = vmatpush.msrb.mxu2 %v3082_v0  ;;  %3092 = vmatpush.msk.msra.mxu0 %vm348_vm0, %v3091_v48  ;;  %v3130_v0 = vld [vmem:[%s5054_s5 + $0x890] sm:$0xff]  ;;  %v3069_v48 = vld [vmem:[%s5054_s5 + $0x6c8] sm:$0xff] }
 0x2c7   : > { %2096 = vmatpush.msrb.mxu3 %v3055_v49  ;;  %2123 = vmatpush.msra.mxu1 %v3064_v50  ;;  %v4569_v49 = vmax.f32 %v1468_v44, 0.0  ;;  %v3103_v50 = vld [vmem:[%s5054_s5 + $0x7c8] sm:$0xff]  ;;  %v3160_v38 = vld [vmem:[%s5054_s5 + $0x970] sm:$0xff]  ;;  %v3158_v44 = vld [vmem:[%s5054_s5 + $0x960] sm:$0xff] }
 0x2c8   : > { %2171 = vmatpush.msrb.mxu2 %v3081_v55  ;;  %2198 = vmatpush.msra.mxu0 %v3090_v53  ;;  %v3129_v55 = vld [vmem:[%s5054_s5 + $0x888] sm:$0xff]  ;;  %v3068_v53 = vld [vmem:[%s5054_s5 + $0x6c0] sm:$0xff] }
 0x2c9   : > { %2097 = vmatpush.msrb.mxu3 %v3054_v56  ;;  %2124 = vmatpush.msra.mxu1 %v3063_v57  ;;  %v3117_v56 = vld [vmem:[%s5054_s5 + $0x838] sm:$0xf]  ;;  %v2161_v57 = vrot.slane %v4569_v49, 1 }
 0x2ca   : > { %2172 = vmatpush.msrb.mxu2 %v3080_v59  ;;  %2199 = vmatpush.msra.mxu0 %v3089_v23  ;;  %v3128_v59 = vld [vmem:[%s5054_s5 + $0x880] sm:$0xff]  ;;  %v3143_v23 = vld [vmem:[%s5054_s5 + $0x8f8] sm:$0xf] }
 0x2cb   : > { %2098 = vmatpush.msrb.mxu3 %v3053_v61  ;;  %2125 = vmatpush.msra.mxu1 %v3062_v62  ;;  %v3116_v61 = vld [vmem:[%s5054_s5 + $0x830] sm:$0xff]  ;;  %v3127_v62 = vld [vmem:[%s5054_s5 + $0x878] sm:$0xff] }
 0x2cc   : > { %2173 = vmatpush.msrb.mxu2 %v3079_v1  ;;  %2200 = vmatpush.msra.mxu0 %v3088_v2  ;;  %v3100_v1 = vld [vmem:[%s5054_s5 + $0x7b0] sm:$0xff]  ;;  %v3115_v2 = vld [vmem:[%s5054_s5 + $0x828] sm:$0xff] }
 0x2cd   : > { %2099 = vmatpush.msrb.mxu3 %v3052_v3  ;;  %2126 = vmatpush.msra.mxu1 %v3061_v4  ;;  %v3126_v3 = vld [vmem:[%s5054_s5 + $0x870] sm:$0xff]  ;;  %v3141_v4 = vld [vmem:[%s5054_s5 + $0x8e8] sm:$0xff] }
 0x2ce   : > { %2174 = vmatpush.msrb.mxu2 %v3078_v5  ;;  %2201 = vmatpush.msra.mxu0 %v3087_v6  ;;  %v3099_v5 = vld [vmem:[%s5054_s5 + $0x7a8] sm:$0xff]  ;;  %v3114_v6 = vld [vmem:[%s5054_s5 + $0x820] sm:$0xff] }
 0x2cf   : > { %2100 = vmatpush.msrb.mxu3 %v3051_v8  ;;  %2127 = vmatpush.msra.mxu1 %v3060_v9  ;;  %v3140_v8 = vld [vmem:[%s5054_s5 + $0x8e0] sm:$0xff] }
 0x2d0   : > { %2175 = vmatpush.msrb.mxu2 %v3077_v10  ;;  %2202 = vmatpush.msra.mxu0 %v3086_v13  ;;  %v3098_v9 = vld [vmem:[%s5054_s5 + $0x7a0] sm:$0xff]  ;;  %v3113_v10 = vld [vmem:[%s5054_s5 + $0x818] sm:$0xff] }
 0x2d1   : > { %2101 = vmatpush.msrb.mxu3 %v3050_v14  ;;  %2128 = vmatpush.msra.mxu1 %v3059_v15  ;;  %v3124_v13 = vld [vmem:[%s5054_s5 + $0x860] sm:$0xff]  ;;  %v3139_v14 = vld [vmem:[%s5054_s5 + $0x8d8] sm:$0xff] }
 0x2d2   : > { %2176 = vmatpush.msrb.mxu2 %v3076_v16  ;;  %2203 = vmatpush.msra.mxu0 %v3085_v17  ;;  %v3097_v15 = vld [vmem:[%s5054_s5 + $0x798] sm:$0xff]  ;;  %v3112_v16 = vld [vmem:[%s5054_s5 + $0x810] sm:$0xff] }
 0x2d3   : > { %2102 = vmatpush.msrb.mxu3 %v3049_v19  ;;  %2129 = vmatpush.msra.mxu1 %v3058_v20  ;;  %v3123_v17 = vld [vmem:[%s5054_s5 + $0x858] sm:$0xff]  ;;  %v3138_v19 = vld [vmem:[%s5054_s5 + $0x8d0] sm:$0xff] }
 0x2d4   : > { %3067 = vmatmul.msk.f32.vlgmr.msra.gmra.mxu1 %vm1528_vm11, %v4477_v18  ;;  %2177 = vmatpush.msrb.mxu2 %v3075_v21  ;;  %v3096_v20 = vld [vmem:[%s5054_s5 + $0x790] sm:$0xff]  ;;  %v3111_v21 = vld [vmem:[%s5054_s5 + $0x808] sm:$0xff] }
 0x2d5   : > { %2204 = vmatpush.msra.mxu0 %v3084_v24  ;;  %2243 = vmatpush.msrb.mxu1 %v3109_v27  ;;  %v3137_v24 = vld [vmem:[%s5054_s5 + $0x8c8] sm:$0xff] }
 0x2d6   : > { %2103 = vmatpush.msrb.mxu3 %v3048_v29  ;;  %3093 = vmatmul.msk.f32.vlgmr.msra.gmra.mxu0 %vm1528_vm11, %v2162_v31  ;;  %v3095_v27 = vld [vmem:[%s5054_s5 + $0x788] sm:$0xff]  ;;  %v3110_v29 = vld [vmem:[%s5054_s5 + $0x800] sm:$0xff]  ;;  %v2236_v31 = vrot.slane %v4477_v18, 2 }
 0x2d7   : > { %2317 = vmatpush.msrb.mxu0 %v3135_v32  ;;  %2178 = vmatpush.msrb.mxu2 %v3074_v33  ;;  %v3136_v32 = vld [vmem:[%s5054_s5 + $0x8c0] sm:$0xff]  ;;  %v3161_v33 = vld [vmem:[%s5054_s5 + $0x978] sm:$0xff] }
 0x2d8   : > { %2244 = vmatpush.msrb.mxu1 %v3108_v35  ;;  %2104 = vmatpush.msrb.mxu3 %v3047_v36  ;;  %v2310_v35 = vrot.slane %v4477_v18, 3  ;;  %v3187_v36 = vld [vmem:[%s5054_s5 + $0xa38] sm:$0xff] }
 0x2d9   : > { %2318 = vmatpush.msrb.mxu0 %v3134_v37  ;;  %2179 = vmatpush.msrb.mxu2 %v3073_v11  ;;  %v2235_v37 = vrot.slane %v4569_v49, 2  ;;  %v3120_v11 = vld [vmem:[%s5054_s5 + $0x840] sm:$0xff] }
 0x2da   : > { %2245 = vmatpush.msrb.mxu1 %v3107_v39  ;;  %2105 = vmatpush.msrb.mxu3 %v3046_v40  ;;  %v3169_v39 = vld [vmem:[%s5054_s5 + $0x9b8] sm:$0xf]  ;;  %v2309_v40 = vrot.slane %v4569_v49, 3 }
 0x2db   : > { %2319 = vmatpush.msrb.mxu0 %v3133_v41  ;;  %2180 = vmatpush.msrb.mxu2 %v3072_v42  ;;  %v3186_v41 = vld [vmem:[%s5054_s5 + $0xa30] sm:$0xff]  ;;  %v3195_v42 = vld [vmem:[%s5054_s5 + $0xa78] sm:$0xf] }
 0x2dc   : > { %2246 = vmatpush.msrb.mxu1 %v3106_v43  ;;  %2106 = vmatpush.msrb.mxu3 %v3045_v26  ;;  %v3159_v43 = vld [vmem:[%s5054_s5 + $0x968] sm:$0xff]  ;;  %v3168_v26 = vld [vmem:[%s5054_s5 + $0x9b0] sm:$0xff] }
 0x2dd   : > { %2320 = vmatpush.msrb.mxu0 %v3132_v25  ;;  %2181 = vmatpush.msrb.mxu2 %v3071_v28  ;;  %v3185_v25 = vld [vmem:[%s5054_s5 + $0xa28] sm:$0xff]  ;;  %v3194_v28 = vld [vmem:[%s5054_s5 + $0xa70] sm:$0xff] }
 0x2de   : > { %2247 = vmatpush.msrb.mxu1 %v3105_v12  ;;  %2107 = vmatpush.msrb.mxu3 %v3044_v45  ;;  %v3167_v12 = vld [vmem:[%s5054_s5 + $0x9a8] sm:$0xff]  ;;  %v3184_v45 = vld [vmem:[%s5054_s5 + $0xa20] sm:$0xff] }
 0x2df   : > { %2321 = vmatpush.msrb.mxu0 %v3131_v47  ;;  %2182 = vmatpush.msrb.mxu2 %v3070_v52  ;;  %v3193_v47 = vld [vmem:[%s5054_s5 + $0xa68] sm:$0xff]  ;;  %v3157_v52 = vld [vmem:[%s5054_s5 + $0x958] sm:$0xff] }
 0x2e0   : > { %2248 = vmatpush.msrb.mxu1 %v3104_v58  ;;  %2108 = vmatpush.msrb.mxu3 %v3043_v46  ;;  %v3166_v58 = vld [vmem:[%s5054_s5 + $0x9a0] sm:$0xff]  ;;  %v3183_v46 = vld [vmem:[%s5054_s5 + $0xa18] sm:$0xff] }
 0x2e1   : > { %2322 = vmatpush.msrb.mxu0 %v3130_v0  ;;  %2183 = vmatpush.msrb.mxu2 %v3069_v48  ;;  %v3192_v0 = vld [vmem:[%s5054_s5 + $0xa60] sm:$0xff]  ;;  %v3156_v48 = vld [vmem:[%s5054_s5 + $0x950] sm:$0xff] }
 0x2e2   : > { %2249 = vmatpush.msrb.mxu1 %v3103_v50  ;;  %2109 = vmatpush.msrb.mxu3 %v3042_v51  ;;  %v3165_v50 = vld [vmem:[%s5054_s5 + $0x998] sm:$0xff]  ;;  %v3182_v51 = vld [vmem:[%s5054_s5 + $0xa10] sm:$0xff] }
 0x2e3   : > { %2323 = vmatpush.msrb.mxu0 %v3129_v55  ;;  %2110 = vmatmul.f32.vlgmr.msrb.gmra.mxu3 %v4569_v49  ;;  %v3191_v55 = vld [vmem:[%s5054_s5 + $0xa58] sm:$0xff] }
 0x2e4   : > { %2184 = vmatpush.msrb.mxu2 %v3068_v53  ;;  %2250 = vmatpush.msrb.mxu1 %v3102_v54  ;;  %v3155_v53 = vld [vmem:[%s5054_s5 + $0x948] sm:$0xff]  ;;  %v3164_v54 = vld [vmem:[%s5054_s5 + $0x990] sm:$0xff] }
 0x2e5   : > { %3118 = vmatpush.msk.msra.mxu3 %vm348_vm0, %v3117_v56  ;;  %2185 = vmatmul.f32.vlgmr.msrb.gmra.mxu2 %v2161_v57  ;;  %v3181_v56 = vld [vmem:[%s5054_s5 + $0xa08] sm:$0xff]  ;;  %v3190_v57 = vld [vmem:[%s5054_s5 + $0xa50] sm:$0xff] }
 0x2e6   : > { %2324 = vmatpush.msrb.mxu0 %v3128_v59  ;;  %3144 = vmatpush.msk.msra.mxu2 %vm348_vm0, %v3143_v23  ;;  %v3154_v59 = vld [vmem:[%s5054_s5 + $0x940] sm:$0xff]  ;;  %v3163_v23 = vld [vmem:[%s5054_s5 + $0x988] sm:$0xff] }
 0x2e7   : > { %2251 = vmatpush.msrb.mxu1 %v3101_v60  ;;  %2272 = vmatpush.msra.mxu3 %v3116_v61  ;;  %v3180_v60 = vld [vmem:[%s5054_s5 + $0xa00] sm:$0xff]  ;;  %v3189_v61 = vld [vmem:[%s5054_s5 + $0xa48] sm:$0xff] }
 0x2e8   : > { %2325 = vmatpush.msrb.mxu0 %v3127_v62  ;;  %2346 = vmatpush.msra.mxu2 %v3142_v63  ;;  %v3153_v62 = vld [vmem:[%s5054_s5 + $0x938] sm:$0xff]  ;;  %v3162_v63 = vld [vmem:[%s5054_s5 + $0x980] sm:$0xff] }
 0x2e9   : > { %2252 = vmatpush.msrb.mxu1 %v3100_v1  ;;  %2273 = vmatpush.msra.mxu3 %v3115_v2  ;;  %v3179_v1 = vld [vmem:[%s5054_s5 + $0x9f8] sm:$0xff]  ;;  %v2384_v2 = vrot.slane %v4477_v18, 4 }
 0x2ea   : > { %2326 = vmatpush.msrb.mxu0 %v3126_v3  ;;  %2347 = vmatpush.msra.mxu2 %v3141_v4  ;;  %v3188_v3 = vld [vmem:[%s5054_s5 + $0xa40] sm:$0xff]  ;;  %v3213_v4 = vld [vmem:[%s5054_s5 + $0xaf8] sm:$0xff] }
 0x2eb   : > { %2253 = vmatpush.msrb.mxu1 %v3099_v5  ;;  %2274 = vmatpush.msra.mxu3 %v3114_v6  ;;  %v3152_v5 = vld [vmem:[%s5054_s5 + $0x930] sm:$0xff]  ;;  %v2458_v6 = vrot.slane %v4477_v18, 5 }
 0x2ec   : > { %2327 = vmatpush.msrb.mxu0 %v3125_v7  ;;  %2348 = vmatpush.msra.mxu2 %v3140_v8  ;;  %v3239_v7 = vld [vmem:[%s5054_s5 + $0xbb8] sm:$0xff]  ;;  %v3178_v8 = vld [vmem:[%s5054_s5 + $0x9f0] sm:$0xff] }
 0x2ed   : > { %2254 = vmatpush.msrb.mxu1 %v3098_v9  ;;  %2275 = vmatpush.msra.mxu3 %v3113_v10  ;;  %v3212_v9 = vld [vmem:[%s5054_s5 + $0xaf0] sm:$0xff]  ;;  %v3151_v10 = vld [vmem:[%s5054_s5 + $0x928] sm:$0xff] }
 0x2ee   : > { %2328 = vmatpush.msrb.mxu0 %v3124_v13  ;;  %2349 = vmatpush.msra.mxu2 %v3139_v14  ;;  %v3238_v13 = vld [vmem:[%s5054_s5 + $0xbb0] sm:$0xff]  ;;  %v3177_v14 = vld [vmem:[%s5054_s5 + $0x9e8] sm:$0xff] }
 0x2ef   : > { %2255 = vmatpush.msrb.mxu1 %v3097_v15  ;;  %2276 = vmatpush.msra.mxu3 %v3112_v16  ;;  %v3211_v15 = vld [vmem:[%s5054_s5 + $0xae8] sm:$0xff]  ;;  %v3150_v16 = vld [vmem:[%s5054_s5 + $0x920] sm:$0xff] }
 0x2f0   : > { %2329 = vmatpush.msrb.mxu0 %v3123_v17  ;;  %2350 = vmatpush.msra.mxu2 %v3138_v19  ;;  %v3237_v17 = vld [vmem:[%s5054_s5 + $0xba8] sm:$0xff]  ;;  %v3176_v19 = vld [vmem:[%s5054_s5 + $0x9e0] sm:$0xff] }
 0x2f1   : > { %2256 = vmatpush.msrb.mxu1 %v3096_v20  ;;  %2277 = vmatpush.msra.mxu3 %v3111_v21  ;;  %v3210_v20 = vld [vmem:[%s5054_s5 + $0xae0] sm:$0xff]  ;;  %v3149_v21 = vld [vmem:[%s5054_s5 + $0x918] sm:$0xff] }
 0x2f2   : > { %2330 = vmatpush.msrb.mxu0 %v3122_v22  ;;  %2351 = vmatpush.msra.mxu2 %v3137_v24  ;;  %v3236_v22 = vld [vmem:[%s5054_s5 + $0xba0] sm:$0xff]  ;;  %v3175_v24 = vld [vmem:[%s5054_s5 + $0x9d8] sm:$0xff] }
 0x2f3   : > { %2257 = vmatpush.msrb.mxu1 %v3095_v27  ;;  %2278 = vmatpush.msra.mxu3 %v3110_v29  ;;  %v3209_v27 = vld [vmem:[%s5054_s5 + $0xad8] sm:$0xff]  ;;  %v3148_v29 = vld [vmem:[%s5054_s5 + $0x910] sm:$0xff] }
 0x2f4   : > { %3119 = vmatmul.msk.f32.vlgmr.msra.gmra.mxu3 %vm1528_vm11, %v2236_v31  ;;  %2331 = vmatpush.msrb.mxu0 %v3121_v30  ;;  %v3235_v30 = vld [vmem:[%s5054_s5 + $0xb98] sm:$0xff]  ;;  %v3174_v31 = vld [vmem:[%s5054_s5 + $0x9d0] sm:$0xff] }
 0x2f5   : > { %2352 = vmatpush.msra.mxu2 %v3136_v32  ;;  %2391 = vmatpush.msrb.mxu3 %v3161_v33  ;;  %v3208_v32 = vld [vmem:[%s5054_s5 + $0xad0] sm:$0xff]  ;;  %v3147_v33 = vld [vmem:[%s5054_s5 + $0x908] sm:$0xff] }
 0x2f6   : > { %2258 = vmatpush.msrb.mxu1 %v3094_v34  ;;  %3145 = vmatmul.msk.f32.vlgmr.msra.gmra.mxu2 %vm1528_vm11, %v2310_v35  ;;  %v3234_v34 = vld [vmem:[%s5054_s5 + $0xb90] sm:$0xff]  ;;  %v3173_v35 = vld [vmem:[%s5054_s5 + $0x9c8] sm:$0xff] }
 0x2f7   : > { %2465 = vmatpush.msrb.mxu2 %v3187_v36  ;;  %2259 = vmatmul.f32.vlgmr.msrb.gmra.mxu1 %v2235_v37  ;;  %v3207_v36 = vld [vmem:[%s5054_s5 + $0xac8] sm:$0xff]  ;;  %v3146_v37 = vld [vmem:[%s5054_s5 + $0x900] sm:$0xff] }
 0x2f8   : > { %2332 = vmatpush.msrb.mxu0 %v3120_v11  ;;  %2392 = vmatpush.msrb.mxu3 %v3160_v38  ;;  %v3233_v11 = vld [vmem:[%s5054_s5 + $0xb88] sm:$0xff]  ;;  %v2383_v38 = vrot.slane %v4569_v49, 4 }
 0x2f9   : > { %3170 = vmatpush.msk.msra.mxu1 %vm348_vm0, %v3169_v39  ;;  %2333 = vmatmul.f32.vlgmr.msrb.gmra.mxu0 %v2309_v40  ;;  %v3172_v39 = vld [vmem:[%s5054_s5 + $0x9c0] sm:$0xff] }
 0x2fa   : > { %2466 = vmatpush.msrb.mxu2 %v3186_v41  ;;  %3196 = vmatpush.msk.msra.mxu0 %vm348_vm0, %v3195_v42  ;;  %v3206_v40 = vld [vmem:[%s5054_s5 + $0xac0] sm:$0xff]  ;;  %v3221_v41 = vld [vmem:[%s5054_s5 + $0xb38] sm:$0xf]  ;;  %v2457_v42 = vrot.slane %v4569_v49, 5 }
 0x2fb   : > { %2393 = vmatpush.msrb.mxu3 %v3159_v43  ;;  %2420 = vmatpush.msra.mxu1 %v3168_v26  ;;  %v3232_v43 = vld [vmem:[%s5054_s5 + $0xb80] sm:$0xff]  ;;  %v3247_v26 = vld [vmem:[%s5054_s5 + $0xbf8] sm:$0xf] }
 0x2fc   : > { %2467 = vmatpush.msrb.mxu2 %v3185_v25  ;;  %2494 = vmatpush.msra.mxu0 %v3194_v28  ;;  %v3205_v25 = vld [vmem:[%s5054_s5 + $0xab8] sm:$0xff]  ;;  %v3220_v28 = vld [vmem:[%s5054_s5 + $0xb30] sm:$0xff] }
 0x2fd   : > { %2394 = vmatpush.msrb.mxu3 %v3158_v44  ;;  %2421 = vmatpush.msra.mxu1 %v3167_v12  ;;  %v3231_v44 = vld [vmem:[%s5054_s5 + $0xb78] sm:$0xff]  ;;  %v3246_v12 = vld [vmem:[%s5054_s5 + $0xbf0] sm:$0xff] }
 0x2fe   : > { %2468 = vmatpush.msrb.mxu2 %v3184_v45  ;;  %2495 = vmatpush.msra.mxu0 %v3193_v47  ;;  %v3204_v45 = vld [vmem:[%s5054_s5 + $0xab0] sm:$0xff]  ;;  %v3219_v47 = vld [vmem:[%s5054_s5 + $0xb28] sm:$0xff] }
 0x2ff   : > { %2395 = vmatpush.msrb.mxu3 %v3157_v52  ;;  %2422 = vmatpush.msra.mxu1 %v3166_v58  ;;  %v3230_v52 = vld [vmem:[%s5054_s5 + $0xb70] sm:$0xff]  ;;  %v3245_v58 = vld [vmem:[%s5054_s5 + $0xbe8] sm:$0xff] }
 0x300   : > { %2469 = vmatpush.msrb.mxu2 %v3183_v46  ;;  %2496 = vmatpush.msra.mxu0 %v3192_v0  ;;  %v3203_v46 = vld [vmem:[%s5054_s5 + $0xaa8] sm:$0xff]  ;;  %v3218_v0 = vld [vmem:[%s5054_s5 + $0xb20] sm:$0xff] }
 0x301   : > { %2396 = vmatpush.msrb.mxu3 %v3156_v48  ;;  %2423 = vmatpush.msra.mxu1 %v3165_v50  ;;  %v3229_v48 = vld [vmem:[%s5054_s5 + $0xb68] sm:$0xff]  ;;  %v3244_v50 = vld [vmem:[%s5054_s5 + $0xbe0] sm:$0xff] }
 0x302   : > { %2470 = vmatpush.msrb.mxu2 %v3182_v51  ;;  %2497 = vmatpush.msra.mxu0 %v3191_v55  ;;  %v3202_v51 = vld [vmem:[%s5054_s5 + $0xaa0] sm:$0xff]  ;;  %v3217_v55 = vld [vmem:[%s5054_s5 + $0xb18] sm:$0xff] }
 0x303   : > { %2397 = vmatpush.msrb.mxu3 %v3155_v53  ;;  %2424 = vmatpush.msra.mxu1 %v3164_v54  ;;  %v3228_v53 = vld [vmem:[%s5054_s5 + $0xb60] sm:$0xff]  ;;  %v3243_v54 = vld [vmem:[%s5054_s5 + $0xbd8] sm:$0xff] }
 0x304   : > { %2471 = vmatpush.msrb.mxu2 %v3181_v56  ;;  %2498 = vmatpush.msra.mxu0 %v3190_v57  ;;  %v3201_v56 = vld [vmem:[%s5054_s5 + $0xa98] sm:$0xff]  ;;  %v3216_v57 = vld [vmem:[%s5054_s5 + $0xb10] sm:$0xff] }
 0x305   : > { %2398 = vmatpush.msrb.mxu3 %v3154_v59  ;;  %2425 = vmatpush.msra.mxu1 %v3163_v23  ;;  %v3227_v59 = vld [vmem:[%s5054_s5 + $0xb58] sm:$0xff]  ;;  %v3242_v23 = vld [vmem:[%s5054_s5 + $0xbd0] sm:$0xff] }
 0x306   : > { %2472 = vmatpush.msrb.mxu2 %v3180_v60  ;;  %2499 = vmatpush.msra.mxu0 %v3189_v61  ;;  %v3200_v60 = vld [vmem:[%s5054_s5 + $0xa90] sm:$0xff]  ;;  %v3215_v61 = vld [vmem:[%s5054_s5 + $0xb08] sm:$0xff] }
 0x307   : > { %2399 = vmatpush.msrb.mxu3 %v3153_v62  ;;  %2426 = vmatpush.msra.mxu1 %v3162_v63  ;;  %v3226_v62 = vld [vmem:[%s5054_s5 + $0xb50] sm:$0xff]  ;;  %v3241_v63 = vld [vmem:[%s5054_s5 + $0xbc8] sm:$0xff] }
 0x308   : > { %3171 = vmatmul.msk.f32.vlgmr.msra.gmra.mxu1 %vm1528_vm11, %v2384_v2  ;;  %2473 = vmatpush.msrb.mxu2 %v3179_v1  ;;  %v3199_v1 = vld [vmem:[%s5054_s5 + $0xa88] sm:$0xff]  ;;  %v3214_v2 = vld [vmem:[%s5054_s5 + $0xb00] sm:$0xff] }
 0x309   : > { %2500 = vmatpush.msra.mxu0 %v3188_v3  ;;  %2539 = vmatpush.msrb.mxu1 %v3213_v4  ;;  %v3225_v3 = vld [vmem:[%s5054_s5 + $0xb48] sm:$0xff]  ;;  %v2532_v4 = vrot.slane %v4477_v18, 6 }
 0x30a   : > { %2400 = vmatpush.msrb.mxu3 %v3152_v5  ;;  %3197 = vmatmul.msk.f32.vlgmr.msra.gmra.mxu0 %vm1528_vm11, %v2458_v6  ;;  %v3240_v5 = vld [vmem:[%s5054_s5 + $0xbc0] sm:$0xff] }
 0x30b   : > { %2613 = vmatpush.msrb.mxu0 %v3239_v7  ;;  %2474 = vmatpush.msrb.mxu2 %v3178_v8  ;;  %v3198_v6 = vld [vmem:[%s5054_s5 + $0xa80] sm:$0xff]  ;;  %v2606_v7 = vrot.slane %v4477_v18, 7  ;;  %v2531_v8 = vrot.slane %v4569_v49, 6 }
 0x30c   : > { %2540 = vmatpush.msrb.mxu1 %v3212_v9  ;;  %2401 = vmatpush.msrb.mxu3 %v3151_v10  ;;  %v3224_v9 = vld [vmem:[%s5054_s5 + $0xb40] sm:$0xff]  ;;  %v2605_v10 = vrot.slane %v4569_v49, 7 }
 0x30d   : > { %2614 = vmatpush.msrb.mxu0 %v3238_v13  ;;  %2475 = vmatpush.msrb.mxu2 %v3177_v14  ;;  %v1571_v13 = vpop.f32.mrf.mxu1 }
 0x30e   : > { %2541 = vmatpush.msrb.mxu1 %v3211_v15  ;;  %2402 = vmatpush.msrb.mxu3 %v3150_v16  ;;  %v1616_v14 = vpop.f32.mrf.mxu3  ;;  %v1551_v15 = vpop.f32.mrf.mxu0 }
 0x30f   : > { %2615 = vmatpush.msrb.mxu0 %v3237_v17  ;;  %2476 = vmatpush.msrb.mxu2 %v3176_v19 }
 0x310   : > { %2542 = vmatpush.msrb.mxu1 %v3210_v20  ;;  %2403 = vmatpush.msrb.mxu3 %v3149_v21  ;;  %v1596_v16 = vpop.f32.mrf.mxu2 }
 0x311   : > { %2616 = vmatpush.msrb.mxu0 %v3236_v22  ;;  %2477 = vmatpush.msrb.mxu2 %v3175_v24  ;;  %v1572_v22 = vadd.f32 %v1571_v13, %v1551_v15  ;;  %v2654_v15 = vld [vmem:[%s5055_s6] sm:$0x1] }
 0x312   : > { %2543 = vmatpush.msrb.mxu1 %v3209_v27  ;;  %2404 = vmatpush.msrb.mxu3 %v3148_v29 }
 0x313   : > { %2617 = vmatpush.msrb.mxu0 %v3235_v30  ;;  %2478 = vmatpush.msrb.mxu2 %v3174_v31  ;;  %v1597_v27 = vadd.f32 %v1596_v16, %v1572_v22 }
 0x314   : > { %2544 = vmatpush.msrb.mxu1 %v3208_v32  ;;  %2405 = vmatpush.msrb.mxu3 %v3147_v33 }
 0x315   : > { %2618 = vmatpush.msrb.mxu0 %v3234_v34  ;;  %2479 = vmatpush.msrb.mxu2 %v3173_v35  ;;  %v1669_v18 = vpop.f32.mrf.mxu1  ;;  %v1617_v32 = vadd.f32 %v1616_v14, %v1597_v27 }
 0x316   : > { %2545 = vmatpush.msrb.mxu1 %v3207_v36  ;;  %2406 = vmatpush.msrb.mxu3 %v3146_v37  ;;  %v1743_v19 = vpop.f32.mrf.mxu0 }
 0x317   : > { %2619 = vmatpush.msrb.mxu0 %v3233_v11  ;;  %2407 = vmatmul.f32.vlgmr.msrb.gmra.mxu3 %v2383_v38 }
 0x318   : > { %2480 = vmatpush.msrb.mxu2 %v3172_v39  ;;  %2546 = vmatpush.msrb.mxu1 %v3206_v40  ;;  %v1689_v17 = vpop.f32.mrf.mxu3  ;;  %v2660_v39 = vld [vmem:[%s5056_s7 + $0x18] sm:$0xff] }
 0x319   : > { %3222 = vmatpush.msk.msra.mxu3 %vm348_vm0, %v3221_v41  ;;  %2481 = vmatmul.f32.vlgmr.msrb.gmra.mxu2 %v2457_v42  ;;  %v1763_v20 = vpop.f32.mrf.mxu2  ;;  %v1690_v31 = vadd.f32 %v1689_v17, %v1669_v18 }
 0x31a   : > { %2620 = vmatpush.msrb.mxu0 %v3232_v43  ;;  %3248 = vmatpush.msk.msra.mxu2 %vm348_vm0, %v3247_v26  ;;  %v1764_v34 = vadd.f32 %v1763_v20, %v1743_v19  ;;  %v2659_v43 = vld [vmem:[%s5056_s7 + $0x10] sm:$0xff]  ;;  %v2661_v19 = vld [vmem:[%s5057_s8] sm:$0x1] }
 0x31b   : > { %2547 = vmatpush.msrb.mxu1 %v3205_v25  ;;  %2568 = vmatpush.msra.mxu3 %v3220_v28  ;;  %v1692_v49 = vadd.f32 %v1690_v31, %v1617_v32  ;;  %v2658_v28 = vld [vmem:[%s5056_s7 + $0x8] sm:$0xff] }
 0x31c   : > { %2621 = vmatpush.msrb.mxu0 %v3231_v44  ;;  %2642 = vmatpush.msra.mxu2 %v3246_v12  ;;  %v2657_v12 = vld [vmem:[%s5056_s7] sm:$0xff] }
 0x31d   : > { %2548 = vmatpush.msrb.mxu1 %v3204_v45  ;;  %2569 = vmatpush.msra.mxu3 %v3219_v47  ;;  %v1766_v38 = vadd.f32 %v1764_v34, %v1692_v49 }
 0x31e   : > { %2622 = vmatpush.msrb.mxu0 %v3230_v52  ;;  %2643 = vmatpush.msra.mxu2 %v3245_v58 }
 0x31f   : > { %2549 = vmatpush.msrb.mxu1 %v3203_v46  ;;  %2570 = vmatpush.msra.mxu3 %v3218_v0  ;;  %v1837_v24 = vpop.f32.mrf.mxu1 }
 0x320   : > { %2623 = vmatpush.msrb.mxu0 %v3229_v48  ;;  %2644 = vmatpush.msra.mxu2 %v3244_v50  ;;  %v1911_v29 = vpop.f32.mrf.mxu0 }
 0x321   : > { %2550 = vmatpush.msrb.mxu1 %v3202_v51  ;;  %2571 = vmatpush.msra.mxu3 %v3217_v55 }
 0x322   : > { %2624 = vmatpush.msrb.mxu0 %v3228_v53  ;;  %2645 = vmatpush.msra.mxu2 %v3243_v54 }
 0x323   : > { %2551 = vmatpush.msrb.mxu1 %v3201_v56  ;;  %2572 = vmatpush.msra.mxu3 %v3216_v57 }
 0x324   : > { %2625 = vmatpush.msrb.mxu0 %v3227_v59  ;;  %2646 = vmatpush.msra.mxu2 %v3242_v23 }
 0x325   : > { %2552 = vmatpush.msrb.mxu1 %v3200_v60  ;;  %2573 = vmatpush.msra.mxu3 %v3215_v61 }
 0x326   : > { %2626 = vmatpush.msrb.mxu0 %v3226_v62  ;;  %2647 = vmatpush.msra.mxu2 %v3241_v63 }
 0x327   : > { %2553 = vmatpush.msrb.mxu1 %v3199_v1  ;;  %2574 = vmatpush.msra.mxu3 %v3214_v2 }
 0x328   : > { %3223 = vmatmul.msk.f32.vlgmr.msra.gmra.mxu3 %vm1528_vm11, %v2532_v4  ;;  %2627 = vmatpush.msrb.mxu0 %v3225_v3 }
 0x329   : > { %2648 = vmatpush.msra.mxu2 %v3240_v5  ;;  %2554 = vmatpush.msrb.mxu1 %v3198_v6 }
 0x32a   : > { %3249 = vmatmul.msk.f32.vlgmr.msra.gmra.mxu2 %vm1528_vm11, %v2606_v7  ;;  %2555 = vmatmul.f32.vlgmr.msrb.gmra.mxu1 %v2531_v8 }
 0x32b   : > { %2628 = vmatpush.msrb.mxu0 %v3224_v9  ;;  %2678 = vmatpush.msrb.mxu3 %v2660_v39 }
 0x32c   : > { %2629 = vmatmul.f32.vlgmr.msrb.gmra.mxu0 %v2605_v10 }
 0x32d   : > { %2679 = vmatpush.msrb.mxu3 %v2659_v43 }
 0x32f   : > { %2680 = vmatpush.msrb.mxu3 %v2658_v28 }
 0x331   : > { %2681 = vmatpush.msrb.mxu3 %v2657_v12 }
 0x332   : > { %v1817_v21 = vpop.f32.mrf.mxu3 }
 0x333   : > { %v1838_v36 = vadd.f32 %v1837_v24, %v1817_v21 }
 0x334   : > { %v1891_v30 = vpop.f32.mrf.mxu2 }
 0x335   : > { %v1840_v40 = vadd.f32 %v1838_v36, %v1766_v38  ;;  %v1912_v41 = vadd.f32 %v1911_v29, %v1891_v30 }
 0x337   : > { %v1914_v44 = vadd.f32 %v1912_v41, %v1840_v40 }
 0x340   : > { %v1965_v35 = vpop.f32.mrf.mxu1 }
 0x342   : > { %v2039_v37 = vpop.f32.mrf.mxu0 }
 0x343   : > { %v1985_v33 = vpop.f32.mrf.mxu3 }
 0x344   : > { %v1986_v26 = vadd.f32 %v1985_v33, %v1965_v35 }
 0x345   : > { %v2059_v11 = vpop.f32.mrf.mxu2 }
 0x346   : > { %v1988_v52 = vadd.f32 %v1986_v26, %v1914_v44  ;;  %v2060_v58 = vadd.f32 %v2059_v11, %v2039_v37 }
 0x348   : > { %v2062_v48 = vadd.f32 %v2060_v58, %v1988_v52 }
 0x351   : > { %v2131_v25 = vpop.f32.mrf.mxu1 }
 0x353   : > { %v2206_v45 = vpop.f32.mrf.mxu0 }
 0x366   : > { %v2111_v42 = vpop.f32.mrf.mxu3 }
 0x367   : > { %v2132_v46 = vadd.f32 %v2131_v25, %v2111_v42 }
 0x368   : > { %v2186_v47 = vpop.f32.mrf.mxu2 }
 0x369   : > { %v2134_v51 = vadd.f32 %v2132_v46, %v2062_v48  ;;  %v2207_v55 = vadd.f32 %v2206_v45, %v2186_v47 }
 0x36b   : > { %v2209_v57 = vadd.f32 %v2207_v55, %v2134_v51 }
 0x374   : > { %v2260_v50 = vpop.f32.mrf.mxu1 }
 0x376   : > { %v2334_v53 = vpop.f32.mrf.mxu0 }
 0x377   : > { %v2280_v0 = vpop.f32.mrf.mxu3 }
 0x378   : > { %v2281_v56 = vadd.f32 %v2280_v0, %v2260_v50 }
 0x379   : > { %v2354_v54 = vpop.f32.mrf.mxu2 }
 0x37a   : > { %v2283_v23 = vadd.f32 %v2281_v56, %v2209_v57  ;;  %v2355_v60 = vadd.f32 %v2354_v54, %v2334_v53 }
 0x37c   : > { %v2357_v2 = vadd.f32 %v2355_v60, %v2283_v23 }
 0x385   : > { %v2428_v61 = vpop.f32.mrf.mxu1 }
 0x387   : > { %v2502_v63 = vpop.f32.mrf.mxu0 }
 0x39a   : > { %v2408_v59 = vpop.f32.mrf.mxu3 }
 0x39b   : > { %v2429_v62 = vadd.f32 %v2428_v61, %v2408_v59 }
 0x39c   : > { %v2482_v1 = vpop.f32.mrf.mxu2 }
 0x39d   : > { %v2431_v3 = vadd.f32 %v2429_v62, %v2357_v2  ;;  %v2503_v4 = vadd.f32 %v2502_v63, %v2482_v1 }
 0x39f   : > { %v2505_v7 = vadd.f32 %v2503_v4, %v2431_v3 }
 0x3a7   : > { %v2556_v5 = vpop.f32.mrf.mxu1 }
 0x3a9   : > { %v2630_v9 = vpop.f32.mrf.mxu0 }
 0x3ab   : > { %v2576_v6 = vpop.f32.mrf.mxu3 }
 0x3ac   : > { %v2577_v8 = vadd.f32 %v2576_v6, %v2556_v5 }
 0x3ad   : > { %v2650_v10 = vpop.f32.mrf.mxu2 }
 0x3ae   : > { %v2579_v13 = vadd.f32 %v2577_v8, %v2505_v7  ;;  %v2651_v14 = vadd.f32 %v2650_v10, %v2630_v9 }
 0x3b0   : > { %v2653_v16 = vadd.f32 %v2651_v14, %v2579_v13 }
 0x3b2   : > { %v2655_v18 = vadd.f32 %v2654_v15, %v2653_v16 }
 0x3b4   : > { %v2656_v17 = vmax.f32 %v2655_v18, 0.0 }
 0x3b6   : > { %3250 = vmatmul.msk.f32.vlgmr.msrb.gmra.mxu3 %vm2662_vm12, %v2656_v17 }
 0x439   : > { %v2683_v20 = vpop.f32.mrf.mxu3 }
 0x43a   : > { %v2684_v21 = vadd.f32 %v2683_v20, %v2661_v19 }
 0x43c   : > { %2687 = vst.msk [vmem:[%s324_s17] sm:$0x1] %vm2686_vm13, %v2684_v21 }
 0x43d   : > { %3372 = shalt.err (!%p3369_p3)
}
 0x43e   : > { %3254 = dma.vmem_to_hbm [thread:$0]  (%p3506_p5), %s2700_s21, 16, %s2702_s22, %s2689_s23  }
 0x43f PF: > { %p3260_p4 = scmp.ge.s32.totalorder %s3407_s12, 2  ;;  %s2713_s29 = sand.u32 1, %s3395_s30  }
 0x440   : > { %s2714_s16 = scalar_lea.sflag [#allocation3], %s2713_s29 }
 0x441   : > { %p3257_p7 = pnand %p3260_p4, %p3510_p6 }
 0x443   : > { %p3258_p8 = pneg %p3257_p7 }
 0x445   : > { %3390 = dma.done.wait (%p3258_p8), %s2714_s16, 16  }
 0x446   : > { %3392 = vsyncadd (%p3258_p8), %s2714_s16, 4294967280  ;;  %p19_p9 = scmp.ge.s32.totalorder %s3493_s15, 4   ;;  %s5065_s30 = smov %s3399_s10 }
 0x447   : > { %s5066_s10 = smov %s3403_s11  ;;  %s5067_s11 = smov %s3504_s18 }
 0x448   : > { %s5068_s12 = smov %s3493_s15  ;;  %21 = sbr.rel (!%p19_p9) target bundleno = 3 (0x3), region = 122 }
 0x44d   :  { %2719 = vsyncpa [#allocation3], 1 }
 0x44e   :  { %2721 = vsyncpa [#allocation3 + $0x1], 1 }

</bundles_post_ra>
